<compile_context>
chip_gen: v7x
topology: tpu7x:2x2x1
jax: 0.10.0
libtpu: 0.0.40
codegen_flags: <defaults>
</compile_context>

<pallas_src>
import numpy as np

import jax
import jax.numpy as jnp
from jax.experimental import pallas as pl
from jax.experimental.pallas import tpu as pltpu


# ----------------------------------------------------------------------------
# Host-side helpers (static, tiny)
# ----------------------------------------------------------------------------
def _gather_indices(h, w, ho, wo, kh, kw, stride, pad):
    """(1, Kh*Kw*Ho*Wo) int32: source pixel index per (tap, output position);
    -1 marks zero padding.  Computed host-side with numpy (static)."""
    oy, ox = np.meshgrid(np.arange(ho), np.arange(wo), indexing="ij")
    oy, ox = oy.reshape(-1), ox.reshape(-1)                    # (Ho*Wo,)
    taps = []
    for ky in range(kh):
        for kx in range(kw):
            iy = oy * stride - pad + ky
            ix = ox * stride - pad + kx
            valid = (iy >= 0) & (iy < h) & (ix >= 0) & (ix < w)
            taps.append(np.where(valid, iy * w + ix, -1))
    return np.concatenate(taps).reshape(1, kh * kw * ho * wo).astype(np.int32)


# ----------------------------------------------------------------------------
# Fused Pallas kernel (one image per grid step, all layers in VMEM)
# ----------------------------------------------------------------------------
def _build_fused_kernel(steps_meta):
    """Kernel running a static list of conv / clip steps on one image.

    refs = (x_ref, *(w, b, src) per conv step, o_ref).  The activation stays
    in VMEM/vregs between layers; only x and the final output cross HBM.
    """
    def kernel(*refs):
        x_ref, o_ref = refs[0], refs[-1]
        conv_refs = refs[1:-1]
        a = x_ref[0]                                           # (Cin0, H0*W0) f32
        ri = 0
        for st in steps_meta:
            if st["kind"] == "conv":
                w_ref, b_ref, src_ref = conv_refs[ri:ri + 3]
                ri += 3
                cin, cout, kk = st["cin"], st["cout"], st["kk"]
                m_in, m_o = st["m_in"], st["m_o"]
                # One-hot gather matrix for all Kh*Kw taps at once:
                # sel[m, t*m_o + mo] = 1 iff input pixel m feeds output pixel
                # mo through tap t (src == -1 -> zero padding, never matches).
                src = src_ref[...]                             # (1, kk*m_o) i32
                row = jax.lax.broadcasted_iota(jnp.int32, (m_in, kk * m_o), 0)
                sel = jnp.where(row == src, 1.0, 0.0).astype(jnp.float32)
                gath = jnp.dot(a, sel,
                               preferred_element_type=jnp.float32)  # (cin, kk*m_o)
                # Bias folded into the accumulator init (single broadcast).
                acc = jnp.broadcast_to(b_ref[...], (cout, m_o)).astype(jnp.float32)
                for t in range(kk):
                    patch = gath[:, t * m_o:(t + 1) * m_o]     # (cin, m_o)
                    acc = acc + jnp.dot(w_ref[t], patch,
                                        preferred_element_type=jnp.float32)
                a = acc
            else:  # "clip": ReLU / Ranger bounding on the in-register value
                if st["lo"] is not None:
                    a = jnp.maximum(a, jnp.float32(st["lo"]))
                if st["hi"] is not None:
                    a = jnp.minimum(a, jnp.float32(st["hi"]))
        o_ref[0] = a.astype(o_ref.dtype)

    return kernel


def _run_conv_plan(x_nchw, steps):
    """Execute a static plan of ('conv', ConvLayer) / ('clip', lo, hi) steps
    as ONE fused pallas_call, gridded over the batch."""
    if not any(s[0] == "conv" for s in steps):
        # Degenerate plan (no conv): plain clamps, nothing worth a kernel.
        for _, lo, hi in steps:
            if lo is not None:
                x_nchw = jnp.maximum(x_nchw, lo)
            if hi is not None:
                x_nchw = jnp.minimum(x_nchw, hi)
        return x_nchw

    n, c0, h0, w0 = x_nchw.shape
    x2 = x_nchw.reshape(n, c0, h0 * w0).astype(jnp.float32)

    inputs = [x2]
    in_specs = [pl.BlockSpec((1, c0, h0 * w0), lambda i: (i, 0, 0))]
    steps_meta = []
    c, h, w = c0, h0, w0
    for st in steps:
        if st[0] == "conv":
            conv = st[1]
            cout, cin, kh, kw = conv.w.shape
            assert cin == c, f"channel mismatch: {cin} vs {c}"
            s_, p_ = conv.stride, conv.padding
            ho = (h + 2 * p_ - kh) // s_ + 1
            wo = (w + 2 * p_ - kw) // s_ + 1
            kk, m_in, m_o = kh * kw, h * w, ho * wo
            # (Kh*Kw, Cout, Cin) so the kernel can index one tap at a time.
            w_arr = jnp.transpose(conv.w, (2, 3, 0, 1)).reshape(kk, cout, cin)
            w_arr = w_arr.astype(jnp.float32)
            b_arr = conv.b.reshape(cout, 1).astype(jnp.float32)
            src = jnp.asarray(_gather_indices(h, w, ho, wo, kh, kw, s_, p_))
            inputs += [w_arr, b_arr, src]
            in_specs += [
                pl.BlockSpec((kk, cout, cin), lambda i: (0, 0, 0)),  # resident
                pl.BlockSpec((cout, 1), lambda i: (0, 0)),           # resident
                pl.BlockSpec((1, kk * m_o), lambda i: (0, 0)),       # resident
            ]
            steps_meta.append(dict(kind="conv", cin=cin, cout=cout, kk=kk,
                                   m_in=m_in, m_o=m_o))
            c, h, w = cout, ho, wo
        else:
            _, lo, hi = st
            steps_meta.append(dict(kind="clip", lo=lo, hi=hi))

    out = pl.pallas_call(
        _build_fused_kernel(steps_meta),
        out_shape=jax.ShapeDtypeStruct((n, c, h * w), jnp.float32),
        grid=(n,),
        in_specs=in_specs,
        out_specs=pl.BlockSpec((1, c, h * w), lambda i: (i, 0, 0)),
        compiler_params=pltpu.CompilerParams(
            dimension_semantics=("parallel",)),
    )(*inputs)
    return out.reshape(n, c, h, w)


# ----------------------------------------------------------------------------
# Layer objects mirroring the nn.Module structure
# ----------------------------------------------------------------------------
class ConvLayer:
    """Stands in for torch.nn.Conv2d (OIHW weights, NCHW activations)."""

    def __init__(self, w, b, stride=1, padding=0):
        self.w, self.b = w, b
        self.stride, self.padding = stride, padding


class ReLULayer:
    """Stands in for torch.nn.ReLU."""
    pass


class RangerSimpleBottleneck:
    """Eval-mode forward of the PyTorch RangerSimpleBottleneck.

    The encoder control flow (act_counter / bounding_enc_act) is replayed at
    trace time to build a static plan of conv / clip steps; the whole plan
    executes as one fused Pallas kernel (two fused kernels if a compressor /
    decompressor sits between encoder and decoder).
    """

    def __init__(self, encoder, decoder, compressor=None, decompressor=None,
                 bounding_enc_act=()):
        self.encoder = list(encoder)
        self.decoder = list(decoder)
        self.compressor = compressor
        self.decompressor = decompressor
        self.bounding_enc_act = list(bounding_enc_act)

    def _encoder_plan(self):
        steps = []
        act_counter = 0
        current_max = self.bounding_enc_act[act_counter]
        for el in self.encoder:
            if isinstance(el, ConvLayer):
                # Reference: a Conv2d matches neither clamp branch.
                steps.append(("conv", el))
            elif isinstance(el, ReLULayer):
                # el(x) == relu == clamp(lo=0); both reference branches then
                # clamp to [0, current_max].  Only the act_counter == 0
                # branch advances the bound.
                steps.append(("clip", 0.0, float(current_max)))
                if act_counter == 0:
                    act_counter += 1
                    current_max = self.bounding_enc_act[act_counter]
            else:
                # TODO(synk): Hardtanh / other layer types are not
                # representable in the fused conv/clip plan.
                raise NotImplementedError(f"unsupported encoder layer: {el!r}")
        return steps

    def _decoder_plan(self):
        steps = []
        for el in self.decoder:
            if isinstance(el, ConvLayer):
                steps.append(("conv", el))
            elif isinstance(el, ReLULayer):
                steps.append(("clip", 0.0, None))
            else:
                # TODO(synk): only Conv2d / ReLU decoder layers are supported.
                raise NotImplementedError(f"unsupported decoder layer: {el!r}")
        return steps

    def encode(self, x):
        z = _run_conv_plan(x, self._encoder_plan())
        if self.compressor is not None:
            z = self.compressor(z)
        return {"z": z}

    def decode(self, z):
        if self.decompressor is not None:
            z = self.decompressor(z)
        return _run_conv_plan(z, self._decoder_plan())

    def forward(self, x):
        # Eval-mode (not self.training) path of the reference module.
        if self.compressor is None and self.decompressor is None:
            # Fuse encoder + decoder into a single pallas_call: intermediate
            # activations never leave VMEM.
            return _run_conv_plan(x, self._encoder_plan() + self._decoder_plan())
        encoded_obj = self.encode(x)
        return self.decode(**encoded_obj)


# ----------------------------------------------------------------------------
# Deterministic parameter init (PyTorch-like uniform(-1/sqrt(fan_in), ...))
# ----------------------------------------------------------------------------
def init_conv(key, cout, cin, k):
    kw_, kb = jax.random.split(key)
    fan_in = cin * k * k
    scale = 1.0 / (fan_in ** 0.5)
    w = jax.random.uniform(kw_, (cout, cin, k, k), jnp.float32, -scale, scale)
    b = jax.random.uniform(kb, (cout,), jnp.float32, -scale, scale)
    return w, b


if __name__ == "__main__":
    key = jax.random.PRNGKey(0)
    k_x, k1, k2, k3, k4 = jax.random.split(key, 5)

    # Input follows the PyTorch NCHW convention.
    x_nchw = jax.random.normal(k_x, (2, 4, 16, 16), jnp.float32)

    # Synthetic encoder: Conv(4->8, s2) -> ReLU -> Conv(8->4) -> ReLU
    w1, b1 = init_conv(k1, 8, 4, 3)
    w2, b2 = init_conv(k2, 4, 8, 3)
    # Synthetic decoder: Conv(4->8) -> ReLU -> Conv(8->4)
    w3, b3 = init_conv(k3, 8, 4, 3)
    w4, b4 = init_conv(k4, 4, 8, 3)

    encoder = [ConvLayer(w1, b1, stride=2, padding=1), ReLULayer(),
               ConvLayer(w2, b2, stride=1, padding=1), ReLULayer()]
    decoder = [ConvLayer(w3, b3, stride=1, padding=1), ReLULayer(),
               ConvLayer(w4, b4, stride=1, padding=1)]

    model = RangerSimpleBottleneck(encoder, decoder,
                                   compressor=None, decompressor=None,
                                   bounding_enc_act=[6.0, 4.0])

    forward = jax.jit(model.forward)
    y = forward(x_nchw)
    jax.block_until_ready(y)

    # Correctness check vs. a pure-JAX f32 reference of the same eval-mode
    # control flow: conv1 -> clip(0,6) -> conv2 -> clip(0,4) -> conv3 ->
    # relu -> conv4.  The kernel is f32 end to end; remaining differences are
    # only MXU multi-pass f32 matmul rounding / accumulation order.
    def conv_ref(x, w, b, stride, padding):
        y_ = jax.lax.conv_general_dilated(
            x, w, window_strides=(stride, stride),
            padding=[(padding, padding), (padding, padding)],
            dimension_numbers=("NCHW", "OIHW", "NCHW"))
        return y_ + b.reshape(1, -1, 1, 1)

    r = jnp.clip(conv_ref(x_nchw, w1, b1, 2, 1), 0.0, 6.0)
    r = jnp.clip(conv_ref(r, w2, b2, 1, 1), 0.0, 4.0)
    r = jnp.maximum(conv_ref(r, w3, b3, 1, 1), 0.0)
    r = conv_ref(r, w4, b4, 1, 1)

    assert y.shape == r.shape, (y.shape, r.shape)
    max_err = float(jnp.max(jnp.abs(y - r)))
    assert max_err < 5e-2, f"mismatch vs reference: {max_err}"

    print("KERNEL_OK")
</pallas_src>

<mosaic_0001>
module attributes {stable_mosaic.version = 11 : i64} {
  func.func @kernel(%arg0: i32, %arg1: memref<1x4x256xf32, #tpu.memory_space<vmem>>, %arg2: memref<9x8x4xf32, #tpu.memory_space<vmem>>, %arg3: memref<8x1xf32, #tpu.memory_space<vmem>>, %arg4: memref<1x576xi32, #tpu.memory_space<vmem>>, %arg5: memref<9x4x8xf32, #tpu.memory_space<vmem>>, %arg6: memref<4x1xf32, #tpu.memory_space<vmem>>, %arg7: memref<1x576xi32, #tpu.memory_space<vmem>>, %arg8: memref<9x8x4xf32, #tpu.memory_space<vmem>>, %arg9: memref<8x1xf32, #tpu.memory_space<vmem>>, %arg10: memref<1x576xi32, #tpu.memory_space<vmem>>, %arg11: memref<9x4x8xf32, #tpu.memory_space<vmem>>, %arg12: memref<4x1xf32, #tpu.memory_space<vmem>>, %arg13: memref<1x576xi32, #tpu.memory_space<vmem>>, %arg14: memref<1x4x64xf32, #tpu.memory_space<vmem>>) attributes {dimension_semantics = [#tpu.dimension_semantics<parallel>], iteration_bounds = array<i64: 2>, scalar_prefetch = 0 : i64, scratch_operands = 0 : i64, tpu.core_type = #tpu.core_type<tc>, window_params = [{transform_indices = @transform_0, window_bounds = array<i64: 1, 4, 256>}, {pipeline_mode = #tpu.pipeline_mode<synchronous>, transform_indices = @transform_1, window_bounds = array<i64: 9, 8, 4>}, {pipeline_mode = #tpu.pipeline_mode<synchronous>, transform_indices = @transform_2, window_bounds = array<i64: 8, 1>}, {pipeline_mode = #tpu.pipeline_mode<synchronous>, transform_indices = @transform_3, window_bounds = array<i64: 1, 576>}, {pipeline_mode = #tpu.pipeline_mode<synchronous>, transform_indices = @transform_4, window_bounds = array<i64: 9, 4, 8>}, {pipeline_mode = #tpu.pipeline_mode<synchronous>, transform_indices = @transform_5, window_bounds = array<i64: 4, 1>}, {pipeline_mode = #tpu.pipeline_mode<synchronous>, transform_indices = @transform_6, window_bounds = array<i64: 1, 576>}, {pipeline_mode = #tpu.pipeline_mode<synchronous>, transform_indices = @transform_7, window_bounds = array<i64: 9, 8, 4>}, {pipeline_mode = #tpu.pipeline_mode<synchronous>, transform_indices = @transform_8, window_bounds = array<i64: 8, 1>}, {pipeline_mode = #tpu.pipeline_mode<synchronous>, transform_indices = @transform_9, window_bounds = array<i64: 1, 576>}, {pipeline_mode = #tpu.pipeline_mode<synchronous>, transform_indices = @transform_10, window_bounds = array<i64: 9, 4, 8>}, {pipeline_mode = #tpu.pipeline_mode<synchronous>, transform_indices = @transform_11, window_bounds = array<i64: 4, 1>}, {pipeline_mode = #tpu.pipeline_mode<synchronous>, transform_indices = @transform_12, window_bounds = array<i64: 1, 576>}, {transform_indices = @transform_13, window_bounds = array<i64: 1, 4, 64>}]} {
    %c0 = arith.constant 0 : index
    %c0_0 = arith.constant 0 : index
    %c0_1 = arith.constant 0 : index
    %0 = vector.load %arg1[%c0, %c0_0, %c0_1] : memref<1x4x256xf32, #tpu.memory_space<vmem>>, vector<1x4x256xf32>
    %1 = vector.shape_cast %0 : vector<1x4x256xf32> to vector<4x256xf32>
    %c0_2 = arith.constant 0 : index
    %c0_3 = arith.constant 0 : index
    %2 = vector.load %arg4[%c0_2, %c0_3] : memref<1x576xi32, #tpu.memory_space<vmem>>, vector<1x576xi32>
    %3 = tpu.iota {dimensions = array<i32: 0>} : vector<256x576xi32>
    %4 = vector.broadcast %2 : vector<1x576xi32> to vector<256x576xi32>
    %5 = arith.cmpi eq, %3, %4 : vector<256x576xi32>
    %cst = arith.constant 1.000000e+00 : f32
    %cst_4 = arith.constant 0.000000e+00 : f32
    %6 = vector.broadcast %cst : f32 to vector<256x576xf32>
    %7 = vector.broadcast %cst_4 : f32 to vector<256x576xf32>
    %8 = arith.select %5, %6, %7 : vector<256x576xi1>, vector<256x576xf32>
    %cst_5 = arith.constant dense<0.000000e+00> : vector<4x576xf32>
    %9 = tpu.matmul %1, %8, %cst_5 {dimension_numbers = #tpu.dot_dimension_numbers<[1], [0], [0], [1], [0, 0, 1, 1], [], []>} : vector<4x256xf32>, vector<256x576xf32>, vector<4x576xf32> -> vector<4x576xf32>
    %c0_6 = arith.constant 0 : index
    %c0_7 = arith.constant 0 : index
    %10 = vector.load %arg3[%c0_6, %c0_7] : memref<8x1xf32, #tpu.memory_space<vmem>>, vector<8x1xf32>
    %11 = vector.shape_cast %10 : vector<8x1xf32> to vector<8x1xf32>
    %12 = vector.broadcast %11 : vector<8x1xf32> to vector<8x64xf32>
    %13 = vector.extract_strided_slice %9 {offsets = [0, 0], sizes = [4, 64], strides = [1, 1]} : vector<4x576xf32> to vector<4x64xf32>
    %c0_8 = arith.constant 0 : index
    %c0_9 = arith.constant 0 : index
    %c0_10 = arith.constant 0 : index
    %14 = vector.load %arg2[%c0_8, %c0_9, %c0_10] : memref<9x8x4xf32, #tpu.memory_space<vmem>>, vector<1x8x4xf32>
    %15 = vector.shape_cast %14 : vector<1x8x4xf32> to vector<8x4xf32>
    %cst_11 = arith.constant dense<0.000000e+00> : vector<8x64xf32>
    %16 = tpu.matmul %15, %13, %cst_11 {dimension_numbers = #tpu.dot_dimension_numbers<[1], [0], [0], [1], [0, 0, 1, 1], [], []>} : vector<8x4xf32>, vector<4x64xf32>, vector<8x64xf32> -> vector<8x64xf32>
    %17 = arith.addf %12, %16 : vector<8x64xf32>
    %18 = vector.extract_strided_slice %9 {offsets = [0, 64], sizes = [4, 64], strides = [1, 1]} : vector<4x576xf32> to vector<4x64xf32>
    %c1 = arith.constant 1 : index
    %c0_12 = arith.constant 0 : index
    %c0_13 = arith.constant 0 : index
    %19 = vector.load %arg2[%c1, %c0_12, %c0_13] : memref<9x8x4xf32, #tpu.memory_space<vmem>>, vector<1x8x4xf32>
    %20 = vector.shape_cast %19 : vector<1x8x4xf32> to vector<8x4xf32>
    %cst_14 = arith.constant dense<0.000000e+00> : vector<8x64xf32>
    %21 = tpu.matmul %20, %18, %cst_14 {dimension_numbers = #tpu.dot_dimension_numbers<[1], [0], [0], [1], [0, 0, 1, 1], [], []>} : vector<8x4xf32>, vector<4x64xf32>, vector<8x64xf32> -> vector<8x64xf32>
    %22 = arith.addf %17, %21 : vector<8x64xf32>
    %23 = vector.extract_strided_slice %9 {offsets = [0, 128], sizes = [4, 64], strides = [1, 1]} : vector<4x576xf32> to vector<4x64xf32>
    %c2 = arith.constant 2 : index
    %c0_15 = arith.constant 0 : index
    %c0_16 = arith.constant 0 : index
    %24 = vector.load %arg2[%c2, %c0_15, %c0_16] : memref<9x8x4xf32, #tpu.memory_space<vmem>>, vector<1x8x4xf32>
    %25 = vector.shape_cast %24 : vector<1x8x4xf32> to vector<8x4xf32>
    %cst_17 = arith.constant dense<0.000000e+00> : vector<8x64xf32>
    %26 = tpu.matmul %25, %23, %cst_17 {dimension_numbers = #tpu.dot_dimension_numbers<[1], [0], [0], [1], [0, 0, 1, 1], [], []>} : vector<8x4xf32>, vector<4x64xf32>, vector<8x64xf32> -> vector<8x64xf32>
    %27 = arith.addf %22, %26 : vector<8x64xf32>
    %28 = vector.extract_strided_slice %9 {offsets = [0, 192], sizes = [4, 64], strides = [1, 1]} : vector<4x576xf32> to vector<4x64xf32>
    %c3 = arith.constant 3 : index
    %c0_18 = arith.constant 0 : index
    %c0_19 = arith.constant 0 : index
    %29 = vector.load %arg2[%c3, %c0_18, %c0_19] : memref<9x8x4xf32, #tpu.memory_space<vmem>>, vector<1x8x4xf32>
    %30 = vector.shape_cast %29 : vector<1x8x4xf32> to vector<8x4xf32>
    %cst_20 = arith.constant dense<0.000000e+00> : vector<8x64xf32>
    %31 = tpu.matmul %30, %28, %cst_20 {dimension_numbers = #tpu.dot_dimension_numbers<[1], [0], [0], [1], [0, 0, 1, 1], [], []>} : vector<8x4xf32>, vector<4x64xf32>, vector<8x64xf32> -> vector<8x64xf32>
    %32 = arith.addf %27, %31 : vector<8x64xf32>
    %33 = vector.extract_strided_slice %9 {offsets = [0, 256], sizes = [4, 64], strides = [1, 1]} : vector<4x576xf32> to vector<4x64xf32>
    %c4 = arith.constant 4 : index
    %c0_21 = arith.constant 0 : index
    %c0_22 = arith.constant 0 : index
    %34 = vector.load %arg2[%c4, %c0_21, %c0_22] : memref<9x8x4xf32, #tpu.memory_space<vmem>>, vector<1x8x4xf32>
    %35 = vector.shape_cast %34 : vector<1x8x4xf32> to vector<8x4xf32>
    %cst_23 = arith.constant dense<0.000000e+00> : vector<8x64xf32>
    %36 = tpu.matmul %35, %33, %cst_23 {dimension_numbers = #tpu.dot_dimension_numbers<[1], [0], [0], [1], [0, 0, 1, 1], [], []>} : vector<8x4xf32>, vector<4x64xf32>, vector<8x64xf32> -> vector<8x64xf32>
    %37 = arith.addf %32, %36 : vector<8x64xf32>
    %38 = vector.extract_strided_slice %9 {offsets = [0, 320], sizes = [4, 64], strides = [1, 1]} : vector<4x576xf32> to vector<4x64xf32>
    %c5 = arith.constant 5 : index
    %c0_24 = arith.constant 0 : index
    %c0_25 = arith.constant 0 : index
    %39 = vector.load %arg2[%c5, %c0_24, %c0_25] : memref<9x8x4xf32, #tpu.memory_space<vmem>>, vector<1x8x4xf32>
    %40 = vector.shape_cast %39 : vector<1x8x4xf32> to vector<8x4xf32>
    %cst_26 = arith.constant dense<0.000000e+00> : vector<8x64xf32>
    %41 = tpu.matmul %40, %38, %cst_26 {dimension_numbers = #tpu.dot_dimension_numbers<[1], [0], [0], [1], [0, 0, 1, 1], [], []>} : vector<8x4xf32>, vector<4x64xf32>, vector<8x64xf32> -> vector<8x64xf32>
    %42 = arith.addf %37, %41 : vector<8x64xf32>
    %43 = vector.extract_strided_slice %9 {offsets = [0, 384], sizes = [4, 64], strides = [1, 1]} : vector<4x576xf32> to vector<4x64xf32>
    %c6 = arith.constant 6 : index
    %c0_27 = arith.constant 0 : index
    %c0_28 = arith.constant 0 : index
    %44 = vector.load %arg2[%c6, %c0_27, %c0_28] : memref<9x8x4xf32, #tpu.memory_space<vmem>>, vector<1x8x4xf32>
    %45 = vector.shape_cast %44 : vector<1x8x4xf32> to vector<8x4xf32>
    %cst_29 = arith.constant dense<0.000000e+00> : vector<8x64xf32>
    %46 = tpu.matmul %45, %43, %cst_29 {dimension_numbers = #tpu.dot_dimension_numbers<[1], [0], [0], [1], [0, 0, 1, 1], [], []>} : vector<8x4xf32>, vector<4x64xf32>, vector<8x64xf32> -> vector<8x64xf32>
    %47 = arith.addf %42, %46 : vector<8x64xf32>
    %48 = vector.extract_strided_slice %9 {offsets = [0, 448], sizes = [4, 64], strides = [1, 1]} : vector<4x576xf32> to vector<4x64xf32>
    %c7 = arith.constant 7 : index
    %c0_30 = arith.constant 0 : index
    %c0_31 = arith.constant 0 : index
    %49 = vector.load %arg2[%c7, %c0_30, %c0_31] : memref<9x8x4xf32, #tpu.memory_space<vmem>>, vector<1x8x4xf32>
    %50 = vector.shape_cast %49 : vector<1x8x4xf32> to vector<8x4xf32>
    %cst_32 = arith.constant dense<0.000000e+00> : vector<8x64xf32>
    %51 = tpu.matmul %50, %48, %cst_32 {dimension_numbers = #tpu.dot_dimension_numbers<[1], [0], [0], [1], [0, 0, 1, 1], [], []>} : vector<8x4xf32>, vector<4x64xf32>, vector<8x64xf32> -> vector<8x64xf32>
    %52 = arith.addf %47, %51 : vector<8x64xf32>
    %53 = vector.extract_strided_slice %9 {offsets = [0, 512], sizes = [4, 64], strides = [1, 1]} : vector<4x576xf32> to vector<4x64xf32>
    %c8 = arith.constant 8 : index
    %c0_33 = arith.constant 0 : index
    %c0_34 = arith.constant 0 : index
    %54 = vector.load %arg2[%c8, %c0_33, %c0_34] : memref<9x8x4xf32, #tpu.memory_space<vmem>>, vector<1x8x4xf32>
    %55 = vector.shape_cast %54 : vector<1x8x4xf32> to vector<8x4xf32>
    %cst_35 = arith.constant dense<0.000000e+00> : vector<8x64xf32>
    %56 = tpu.matmul %55, %53, %cst_35 {dimension_numbers = #tpu.dot_dimension_numbers<[1], [0], [0], [1], [0, 0, 1, 1], [], []>} : vector<8x4xf32>, vector<4x64xf32>, vector<8x64xf32> -> vector<8x64xf32>
    %57 = arith.addf %52, %56 : vector<8x64xf32>
    %cst_36 = arith.constant 0.000000e+00 : f32
    %58 = vector.broadcast %cst_36 : f32 to vector<8x64xf32>
    %59 = arith.maximumf %57, %58 : vector<8x64xf32>
    %cst_37 = arith.constant 6.000000e+00 : f32
    %60 = vector.broadcast %cst_37 : f32 to vector<8x64xf32>
    %61 = arith.minimumf %59, %60 : vector<8x64xf32>
    %c0_38 = arith.constant 0 : index
    %c0_39 = arith.constant 0 : index
    %62 = vector.load %arg7[%c0_38, %c0_39] : memref<1x576xi32, #tpu.memory_space<vmem>>, vector<1x576xi32>
    %63 = tpu.iota {dimensions = array<i32: 0>} : vector<64x576xi32>
    %64 = vector.broadcast %62 : vector<1x576xi32> to vector<64x576xi32>
    %65 = arith.cmpi eq, %63, %64 : vector<64x576xi32>
    %cst_40 = arith.constant 1.000000e+00 : f32
    %cst_41 = arith.constant 0.000000e+00 : f32
    %66 = vector.broadcast %cst_40 : f32 to vector<64x576xf32>
    %67 = vector.broadcast %cst_41 : f32 to vector<64x576xf32>
    %68 = arith.select %65, %66, %67 : vector<64x576xi1>, vector<64x576xf32>
    %cst_42 = arith.constant dense<0.000000e+00> : vector<8x576xf32>
    %69 = tpu.matmul %61, %68, %cst_42 {dimension_numbers = #tpu.dot_dimension_numbers<[1], [0], [0], [1], [0, 0, 1, 1], [], []>} : vector<8x64xf32>, vector<64x576xf32>, vector<8x576xf32> -> vector<8x576xf32>
    %c0_43 = arith.constant 0 : index
    %c0_44 = arith.constant 0 : index
    %70 = vector.load %arg6[%c0_43, %c0_44] : memref<4x1xf32, #tpu.memory_space<vmem>>, vector<4x1xf32>
    %71 = vector.shape_cast %70 : vector<4x1xf32> to vector<4x1xf32>
    %72 = vector.broadcast %71 : vector<4x1xf32> to vector<4x64xf32>
    %73 = vector.extract_strided_slice %69 {offsets = [0, 0], sizes = [8, 64], strides = [1, 1]} : vector<8x576xf32> to vector<8x64xf32>
    %c0_45 = arith.constant 0 : index
    %c0_46 = arith.constant 0 : index
    %c0_47 = arith.constant 0 : index
    %74 = vector.load %arg5[%c0_45, %c0_46, %c0_47] : memref<9x4x8xf32, #tpu.memory_space<vmem>>, vector<1x4x8xf32>
    %75 = vector.shape_cast %74 : vector<1x4x8xf32> to vector<4x8xf32>
    %cst_48 = arith.constant dense<0.000000e+00> : vector<4x64xf32>
    %76 = tpu.matmul %75, %73, %cst_48 {dimension_numbers = #tpu.dot_dimension_numbers<[1], [0], [0], [1], [0, 0, 1, 1], [], []>} : vector<4x8xf32>, vector<8x64xf32>, vector<4x64xf32> -> vector<4x64xf32>
    %77 = arith.addf %72, %76 : vector<4x64xf32>
    %78 = vector.extract_strided_slice %69 {offsets = [0, 64], sizes = [8, 64], strides = [1, 1]} : vector<8x576xf32> to vector<8x64xf32>
    %c1_49 = arith.constant 1 : index
    %c0_50 = arith.constant 0 : index
    %c0_51 = arith.constant 0 : index
    %79 = vector.load %arg5[%c1_49, %c0_50, %c0_51] : memref<9x4x8xf32, #tpu.memory_space<vmem>>, vector<1x4x8xf32>
    %80 = vector.shape_cast %79 : vector<1x4x8xf32> to vector<4x8xf32>
    %cst_52 = arith.constant dense<0.000000e+00> : vector<4x64xf32>
    %81 = tpu.matmul %80, %78, %cst_52 {dimension_numbers = #tpu.dot_dimension_numbers<[1], [0], [0], [1], [0, 0, 1, 1], [], []>} : vector<4x8xf32>, vector<8x64xf32>, vector<4x64xf32> -> vector<4x64xf32>
    %82 = arith.addf %77, %81 : vector<4x64xf32>
    %83 = vector.extract_strided_slice %69 {offsets = [0, 128], sizes = [8, 64], strides = [1, 1]} : vector<8x576xf32> to vector<8x64xf32>
    %c2_53 = arith.constant 2 : index
    %c0_54 = arith.constant 0 : index
    %c0_55 = arith.constant 0 : index
    %84 = vector.load %arg5[%c2_53, %c0_54, %c0_55] : memref<9x4x8xf32, #tpu.memory_space<vmem>>, vector<1x4x8xf32>
    %85 = vector.shape_cast %84 : vector<1x4x8xf32> to vector<4x8xf32>
    %cst_56 = arith.constant dense<0.000000e+00> : vector<4x64xf32>
    %86 = tpu.matmul %85, %83, %cst_56 {dimension_numbers = #tpu.dot_dimension_numbers<[1], [0], [0], [1], [0, 0, 1, 1], [], []>} : vector<4x8xf32>, vector<8x64xf32>, vector<4x64xf32> -> vector<4x64xf32>
    %87 = arith.addf %82, %86 : vector<4x64xf32>
    %88 = vector.extract_strided_slice %69 {offsets = [0, 192], sizes = [8, 64], strides = [1, 1]} : vector<8x576xf32> to vector<8x64xf32>
    %c3_57 = arith.constant 3 : index
    %c0_58 = arith.constant 0 : index
    %c0_59 = arith.constant 0 : index
    %89 = vector.load %arg5[%c3_57, %c0_58, %c0_59] : memref<9x4x8xf32, #tpu.memory_space<vmem>>, vector<1x4x8xf32>
    %90 = vector.shape_cast %89 : vector<1x4x8xf32> to vector<4x8xf32>
    %cst_60 = arith.constant dense<0.000000e+00> : vector<4x64xf32>
    %91 = tpu.matmul %90, %88, %cst_60 {dimension_numbers = #tpu.dot_dimension_numbers<[1], [0], [0], [1], [0, 0, 1, 1], [], []>} : vector<4x8xf32>, vector<8x64xf32>, vector<4x64xf32> -> vector<4x64xf32>
    %92 = arith.addf %87, %91 : vector<4x64xf32>
    %93 = vector.extract_strided_slice %69 {offsets = [0, 256], sizes = [8, 64], strides = [1, 1]} : vector<8x576xf32> to vector<8x64xf32>
    %c4_61 = arith.constant 4 : index
    %c0_62 = arith.constant 0 : index
    %c0_63 = arith.constant 0 : index
    %94 = vector.load %arg5[%c4_61, %c0_62, %c0_63] : memref<9x4x8xf32, #tpu.memory_space<vmem>>, vector<1x4x8xf32>
    %95 = vector.shape_cast %94 : vector<1x4x8xf32> to vector<4x8xf32>
    %cst_64 = arith.constant dense<0.000000e+00> : vector<4x64xf32>
    %96 = tpu.matmul %95, %93, %cst_64 {dimension_numbers = #tpu.dot_dimension_numbers<[1], [0], [0], [1], [0, 0, 1, 1], [], []>} : vector<4x8xf32>, vector<8x64xf32>, vector<4x64xf32> -> vector<4x64xf32>
    %97 = arith.addf %92, %96 : vector<4x64xf32>
    %98 = vector.extract_strided_slice %69 {offsets = [0, 320], sizes = [8, 64], strides = [1, 1]} : vector<8x576xf32> to vector<8x64xf32>
    %c5_65 = arith.constant 5 : index
    %c0_66 = arith.constant 0 : index
    %c0_67 = arith.constant 0 : index
    %99 = vector.load %arg5[%c5_65, %c0_66, %c0_67] : memref<9x4x8xf32, #tpu.memory_space<vmem>>, vector<1x4x8xf32>
    %100 = vector.shape_cast %99 : vector<1x4x8xf32> to vector<4x8xf32>
    %cst_68 = arith.constant dense<0.000000e+00> : vector<4x64xf32>
    %101 = tpu.matmul %100, %98, %cst_68 {dimension_numbers = #tpu.dot_dimension_numbers<[1], [0], [0], [1], [0, 0, 1, 1], [], []>} : vector<4x8xf32>, vector<8x64xf32>, vector<4x64xf32> -> vector<4x64xf32>
    %102 = arith.addf %97, %101 : vector<4x64xf32>
    %103 = vector.extract_strided_slice %69 {offsets = [0, 384], sizes = [8, 64], strides = [1, 1]} : vector<8x576xf32> to vector<8x64xf32>
    %c6_69 = arith.constant 6 : index
    %c0_70 = arith.constant 0 : index
    %c0_71 = arith.constant 0 : index
    %104 = vector.load %arg5[%c6_69, %c0_70, %c0_71] : memref<9x4x8xf32, #tpu.memory_space<vmem>>, vector<1x4x8xf32>
    %105 = vector.shape_cast %104 : vector<1x4x8xf32> to vector<4x8xf32>
    %cst_72 = arith.constant dense<0.000000e+00> : vector<4x64xf32>
    %106 = tpu.matmul %105, %103, %cst_72 {dimension_numbers = #tpu.dot_dimension_numbers<[1], [0], [0], [1], [0, 0, 1, 1], [], []>} : vector<4x8xf32>, vector<8x64xf32>, vector<4x64xf32> -> vector<4x64xf32>
    %107 = arith.addf %102, %106 : vector<4x64xf32>
    %108 = vector.extract_strided_slice %69 {offsets = [0, 448], sizes = [8, 64], strides = [1, 1]} : vector<8x576xf32> to vector<8x64xf32>
    %c7_73 = arith.constant 7 : index
    %c0_74 = arith.constant 0 : index
    %c0_75 = arith.constant 0 : index
    %109 = vector.load %arg5[%c7_73, %c0_74, %c0_75] : memref<9x4x8xf32, #tpu.memory_space<vmem>>, vector<1x4x8xf32>
    %110 = vector.shape_cast %109 : vector<1x4x8xf32> to vector<4x8xf32>
    %cst_76 = arith.constant dense<0.000000e+00> : vector<4x64xf32>
    %111 = tpu.matmul %110, %108, %cst_76 {dimension_numbers = #tpu.dot_dimension_numbers<[1], [0], [0], [1], [0, 0, 1, 1], [], []>} : vector<4x8xf32>, vector<8x64xf32>, vector<4x64xf32> -> vector<4x64xf32>
    %112 = arith.addf %107, %111 : vector<4x64xf32>
    %113 = vector.extract_strided_slice %69 {offsets = [0, 512], sizes = [8, 64], strides = [1, 1]} : vector<8x576xf32> to vector<8x64xf32>
    %c8_77 = arith.constant 8 : index
    %c0_78 = arith.constant 0 : index
    %c0_79 = arith.constant 0 : index
    %114 = vector.load %arg5[%c8_77, %c0_78, %c0_79] : memref<9x4x8xf32, #tpu.memory_space<vmem>>, vector<1x4x8xf32>
    %115 = vector.shape_cast %114 : vector<1x4x8xf32> to vector<4x8xf32>
    %cst_80 = arith.constant dense<0.000000e+00> : vector<4x64xf32>
    %116 = tpu.matmul %115, %113, %cst_80 {dimension_numbers = #tpu.dot_dimension_numbers<[1], [0], [0], [1], [0, 0, 1, 1], [], []>} : vector<4x8xf32>, vector<8x64xf32>, vector<4x64xf32> -> vector<4x64xf32>
    %117 = arith.addf %112, %116 : vector<4x64xf32>
    %cst_81 = arith.constant 0.000000e+00 : f32
    %118 = vector.broadcast %cst_81 : f32 to vector<4x64xf32>
    %119 = arith.maximumf %117, %118 : vector<4x64xf32>
    %cst_82 = arith.constant 4.000000e+00 : f32
    %120 = vector.broadcast %cst_82 : f32 to vector<4x64xf32>
    %121 = arith.minimumf %119, %120 : vector<4x64xf32>
    %c0_83 = arith.constant 0 : index
    %c0_84 = arith.constant 0 : index
    %122 = vector.load %arg10[%c0_83, %c0_84] : memref<1x576xi32, #tpu.memory_space<vmem>>, vector<1x576xi32>
    %123 = tpu.iota {dimensions = array<i32: 0>} : vector<64x576xi32>
    %124 = vector.broadcast %122 : vector<1x576xi32> to vector<64x576xi32>
    %125 = arith.cmpi eq, %123, %124 : vector<64x576xi32>
    %cst_85 = arith.constant 1.000000e+00 : f32
    %cst_86 = arith.constant 0.000000e+00 : f32
    %126 = vector.broadcast %cst_85 : f32 to vector<64x576xf32>
    %127 = vector.broadcast %cst_86 : f32 to vector<64x576xf32>
    %128 = arith.select %125, %126, %127 : vector<64x576xi1>, vector<64x576xf32>
    %cst_87 = arith.constant dense<0.000000e+00> : vector<4x576xf32>
    %129 = tpu.matmul %121, %128, %cst_87 {dimension_numbers = #tpu.dot_dimension_numbers<[1], [0], [0], [1], [0, 0, 1, 1], [], []>} : vector<4x64xf32>, vector<64x576xf32>, vector<4x576xf32> -> vector<4x576xf32>
    %c0_88 = arith.constant 0 : index
    %c0_89 = arith.constant 0 : index
    %130 = vector.load %arg9[%c0_88, %c0_89] : memref<8x1xf32, #tpu.memory_space<vmem>>, vector<8x1xf32>
    %131 = vector.shape_cast %130 : vector<8x1xf32> to vector<8x1xf32>
    %132 = vector.broadcast %131 : vector<8x1xf32> to vector<8x64xf32>
    %133 = vector.extract_strided_slice %129 {offsets = [0, 0], sizes = [4, 64], strides = [1, 1]} : vector<4x576xf32> to vector<4x64xf32>
    %c0_90 = arith.constant 0 : index
    %c0_91 = arith.constant 0 : index
    %c0_92 = arith.constant 0 : index
    %134 = vector.load %arg8[%c0_90, %c0_91, %c0_92] : memref<9x8x4xf32, #tpu.memory_space<vmem>>, vector<1x8x4xf32>
    %135 = vector.shape_cast %134 : vector<1x8x4xf32> to vector<8x4xf32>
    %cst_93 = arith.constant dense<0.000000e+00> : vector<8x64xf32>
    %136 = tpu.matmul %135, %133, %cst_93 {dimension_numbers = #tpu.dot_dimension_numbers<[1], [0], [0], [1], [0, 0, 1, 1], [], []>} : vector<8x4xf32>, vector<4x64xf32>, vector<8x64xf32> -> vector<8x64xf32>
    %137 = arith.addf %132, %136 : vector<8x64xf32>
    %138 = vector.extract_strided_slice %129 {offsets = [0, 64], sizes = [4, 64], strides = [1, 1]} : vector<4x576xf32> to vector<4x64xf32>
    %c1_94 = arith.constant 1 : index
    %c0_95 = arith.constant 0 : index
    %c0_96 = arith.constant 0 : index
    %139 = vector.load %arg8[%c1_94, %c0_95, %c0_96] : memref<9x8x4xf32, #tpu.memory_space<vmem>>, vector<1x8x4xf32>
    %140 = vector.shape_cast %139 : vector<1x8x4xf32> to vector<8x4xf32>
    %cst_97 = arith.constant dense<0.000000e+00> : vector<8x64xf32>
    %141 = tpu.matmul %140, %138, %cst_97 {dimension_numbers = #tpu.dot_dimension_numbers<[1], [0], [0], [1], [0, 0, 1, 1], [], []>} : vector<8x4xf32>, vector<4x64xf32>, vector<8x64xf32> -> vector<8x64xf32>
    %142 = arith.addf %137, %141 : vector<8x64xf32>
    %143 = vector.extract_strided_slice %129 {offsets = [0, 128], sizes = [4, 64], strides = [1, 1]} : vector<4x576xf32> to vector<4x64xf32>
    %c2_98 = arith.constant 2 : index
    %c0_99 = arith.constant 0 : index
    %c0_100 = arith.constant 0 : index
    %144 = vector.load %arg8[%c2_98, %c0_99, %c0_100] : memref<9x8x4xf32, #tpu.memory_space<vmem>>, vector<1x8x4xf32>
    %145 = vector.shape_cast %144 : vector<1x8x4xf32> to vector<8x4xf32>
    %cst_101 = arith.constant dense<0.000000e+00> : vector<8x64xf32>
    %146 = tpu.matmul %145, %143, %cst_101 {dimension_numbers = #tpu.dot_dimension_numbers<[1], [0], [0], [1], [0, 0, 1, 1], [], []>} : vector<8x4xf32>, vector<4x64xf32>, vector<8x64xf32> -> vector<8x64xf32>
    %147 = arith.addf %142, %146 : vector<8x64xf32>
    %148 = vector.extract_strided_slice %129 {offsets = [0, 192], sizes = [4, 64], strides = [1, 1]} : vector<4x576xf32> to vector<4x64xf32>
    %c3_102 = arith.constant 3 : index
    %c0_103 = arith.constant 0 : index
    %c0_104 = arith.constant 0 : index
    %149 = vector.load %arg8[%c3_102, %c0_103, %c0_104] : memref<9x8x4xf32, #tpu.memory_space<vmem>>, vector<1x8x4xf32>
    %150 = vector.shape_cast %149 : vector<1x8x4xf32> to vector<8x4xf32>
    %cst_105 = arith.constant dense<0.000000e+00> : vector<8x64xf32>
    %151 = tpu.matmul %150, %148, %cst_105 {dimension_numbers = #tpu.dot_dimension_numbers<[1], [0], [0], [1], [0, 0, 1, 1], [], []>} : vector<8x4xf32>, vector<4x64xf32>, vector<8x64xf32> -> vector<8x64xf32>
    %152 = arith.addf %147, %151 : vector<8x64xf32>
    %153 = vector.extract_strided_slice %129 {offsets = [0, 256], sizes = [4, 64], strides = [1, 1]} : vector<4x576xf32> to vector<4x64xf32>
    %c4_106 = arith.constant 4 : index
    %c0_107 = arith.constant 0 : index
    %c0_108 = arith.constant 0 : index
    %154 = vector.load %arg8[%c4_106, %c0_107, %c0_108] : memref<9x8x4xf32, #tpu.memory_space<vmem>>, vector<1x8x4xf32>
    %155 = vector.shape_cast %154 : vector<1x8x4xf32> to vector<8x4xf32>
    %cst_109 = arith.constant dense<0.000000e+00> : vector<8x64xf32>
    %156 = tpu.matmul %155, %153, %cst_109 {dimension_numbers = #tpu.dot_dimension_numbers<[1], [0], [0], [1], [0, 0, 1, 1], [], []>} : vector<8x4xf32>, vector<4x64xf32>, vector<8x64xf32> -> vector<8x64xf32>
    %157 = arith.addf %152, %156 : vector<8x64xf32>
    %158 = vector.extract_strided_slice %129 {offsets = [0, 320], sizes = [4, 64], strides = [1, 1]} : vector<4x576xf32> to vector<4x64xf32>
    %c5_110 = arith.constant 5 : index
    %c0_111 = arith.constant 0 : index
    %c0_112 = arith.constant 0 : index
    %159 = vector.load %arg8[%c5_110, %c0_111, %c0_112] : memref<9x8x4xf32, #tpu.memory_space<vmem>>, vector<1x8x4xf32>
    %160 = vector.shape_cast %159 : vector<1x8x4xf32> to vector<8x4xf32>
    %cst_113 = arith.constant dense<0.000000e+00> : vector<8x64xf32>
    %161 = tpu.matmul %160, %158, %cst_113 {dimension_numbers = #tpu.dot_dimension_numbers<[1], [0], [0], [1], [0, 0, 1, 1], [], []>} : vector<8x4xf32>, vector<4x64xf32>, vector<8x64xf32> -> vector<8x64xf32>
    %162 = arith.addf %157, %161 : vector<8x64xf32>
    %163 = vector.extract_strided_slice %129 {offsets = [0, 384], sizes = [4, 64], strides = [1, 1]} : vector<4x576xf32> to vector<4x64xf32>
    %c6_114 = arith.constant 6 : index
    %c0_115 = arith.constant 0 : index
    %c0_116 = arith.constant 0 : index
    %164 = vector.load %arg8[%c6_114, %c0_115, %c0_116] : memref<9x8x4xf32, #tpu.memory_space<vmem>>, vector<1x8x4xf32>
    %165 = vector.shape_cast %164 : vector<1x8x4xf32> to vector<8x4xf32>
    %cst_117 = arith.constant dense<0.000000e+00> : vector<8x64xf32>
    %166 = tpu.matmul %165, %163, %cst_117 {dimension_numbers = #tpu.dot_dimension_numbers<[1], [0], [0], [1], [0, 0, 1, 1], [], []>} : vector<8x4xf32>, vector<4x64xf32>, vector<8x64xf32> -> vector<8x64xf32>
    %167 = arith.addf %162, %166 : vector<8x64xf32>
    %168 = vector.extract_strided_slice %129 {offsets = [0, 448], sizes = [4, 64], strides = [1, 1]} : vector<4x576xf32> to vector<4x64xf32>
    %c7_118 = arith.constant 7 : index
    %c0_119 = arith.constant 0 : index
    %c0_120 = arith.constant 0 : index
    %169 = vector.load %arg8[%c7_118, %c0_119, %c0_120] : memref<9x8x4xf32, #tpu.memory_space<vmem>>, vector<1x8x4xf32>
    %170 = vector.shape_cast %169 : vector<1x8x4xf32> to vector<8x4xf32>
    %cst_121 = arith.constant dense<0.000000e+00> : vector<8x64xf32>
    %171 = tpu.matmul %170, %168, %cst_121 {dimension_numbers = #tpu.dot_dimension_numbers<[1], [0], [0], [1], [0, 0, 1, 1], [], []>} : vector<8x4xf32>, vector<4x64xf32>, vector<8x64xf32> -> vector<8x64xf32>
    %172 = arith.addf %167, %171 : vector<8x64xf32>
    %173 = vector.extract_strided_slice %129 {offsets = [0, 512], sizes = [4, 64], strides = [1, 1]} : vector<4x576xf32> to vector<4x64xf32>
    %c8_122 = arith.constant 8 : index
    %c0_123 = arith.constant 0 : index
    %c0_124 = arith.constant 0 : index
    %174 = vector.load %arg8[%c8_122, %c0_123, %c0_124] : memref<9x8x4xf32, #tpu.memory_space<vmem>>, vector<1x8x4xf32>
    %175 = vector.shape_cast %174 : vector<1x8x4xf32> to vector<8x4xf32>
    %cst_125 = arith.constant dense<0.000000e+00> : vector<8x64xf32>
    %176 = tpu.matmul %175, %173, %cst_125 {dimension_numbers = #tpu.dot_dimension_numbers<[1], [0], [0], [1], [0, 0, 1, 1], [], []>} : vector<8x4xf32>, vector<4x64xf32>, vector<8x64xf32> -> vector<8x64xf32>
    %177 = arith.addf %172, %176 : vector<8x64xf32>
    %cst_126 = arith.constant 0.000000e+00 : f32
    %178 = vector.broadcast %cst_126 : f32 to vector<8x64xf32>
    %179 = arith.maximumf %177, %178 : vector<8x64xf32>
    %c0_127 = arith.constant 0 : index
    %c0_128 = arith.constant 0 : index
    %180 = vector.load %arg13[%c0_127, %c0_128] : memref<1x576xi32, #tpu.memory_space<vmem>>, vector<1x576xi32>
    %181 = tpu.iota {dimensions = array<i32: 0>} : vector<64x576xi32>
    %182 = vector.broadcast %180 : vector<1x576xi32> to vector<64x576xi32>
    %183 = arith.cmpi eq, %181, %182 : vector<64x576xi32>
    %cst_129 = arith.constant 1.000000e+00 : f32
    %cst_130 = arith.constant 0.000000e+00 : f32
    %184 = vector.broadcast %cst_129 : f32 to vector<64x576xf32>
    %185 = vector.broadcast %cst_130 : f32 to vector<64x576xf32>
    %186 = arith.select %183, %184, %185 : vector<64x576xi1>, vector<64x576xf32>
    %cst_131 = arith.constant dense<0.000000e+00> : vector<8x576xf32>
    %187 = tpu.matmul %179, %186, %cst_131 {dimension_numbers = #tpu.dot_dimension_numbers<[1], [0], [0], [1], [0, 0, 1, 1], [], []>} : vector<8x64xf32>, vector<64x576xf32>, vector<8x576xf32> -> vector<8x576xf32>
    %c0_132 = arith.constant 0 : index
    %c0_133 = arith.constant 0 : index
    %188 = vector.load %arg12[%c0_132, %c0_133] : memref<4x1xf32, #tpu.memory_space<vmem>>, vector<4x1xf32>
    %189 = vector.shape_cast %188 : vector<4x1xf32> to vector<4x1xf32>
    %190 = vector.broadcast %189 : vector<4x1xf32> to vector<4x64xf32>
    %191 = vector.extract_strided_slice %187 {offsets = [0, 0], sizes = [8, 64], strides = [1, 1]} : vector<8x576xf32> to vector<8x64xf32>
    %c0_134 = arith.constant 0 : index
    %c0_135 = arith.constant 0 : index
    %c0_136 = arith.constant 0 : index
    %192 = vector.load %arg11[%c0_134, %c0_135, %c0_136] : memref<9x4x8xf32, #tpu.memory_space<vmem>>, vector<1x4x8xf32>
    %193 = vector.shape_cast %192 : vector<1x4x8xf32> to vector<4x8xf32>
    %cst_137 = arith.constant dense<0.000000e+00> : vector<4x64xf32>
    %194 = tpu.matmul %193, %191, %cst_137 {dimension_numbers = #tpu.dot_dimension_numbers<[1], [0], [0], [1], [0, 0, 1, 1], [], []>} : vector<4x8xf32>, vector<8x64xf32>, vector<4x64xf32> -> vector<4x64xf32>
    %195 = arith.addf %190, %194 : vector<4x64xf32>
    %196 = vector.extract_strided_slice %187 {offsets = [0, 64], sizes = [8, 64], strides = [1, 1]} : vector<8x576xf32> to vector<8x64xf32>
    %c1_138 = arith.constant 1 : index
    %c0_139 = arith.constant 0 : index
    %c0_140 = arith.constant 0 : index
    %197 = vector.load %arg11[%c1_138, %c0_139, %c0_140] : memref<9x4x8xf32, #tpu.memory_space<vmem>>, vector<1x4x8xf32>
    %198 = vector.shape_cast %197 : vector<1x4x8xf32> to vector<4x8xf32>
    %cst_141 = arith.constant dense<0.000000e+00> : vector<4x64xf32>
    %199 = tpu.matmul %198, %196, %cst_141 {dimension_numbers = #tpu.dot_dimension_numbers<[1], [0], [0], [1], [0, 0, 1, 1], [], []>} : vector<4x8xf32>, vector<8x64xf32>, vector<4x64xf32> -> vector<4x64xf32>
    %200 = arith.addf %195, %199 : vector<4x64xf32>
    %201 = vector.extract_strided_slice %187 {offsets = [0, 128], sizes = [8, 64], strides = [1, 1]} : vector<8x576xf32> to vector<8x64xf32>
    %c2_142 = arith.constant 2 : index
    %c0_143 = arith.constant 0 : index
    %c0_144 = arith.constant 0 : index
    %202 = vector.load %arg11[%c2_142, %c0_143, %c0_144] : memref<9x4x8xf32, #tpu.memory_space<vmem>>, vector<1x4x8xf32>
    %203 = vector.shape_cast %202 : vector<1x4x8xf32> to vector<4x8xf32>
    %cst_145 = arith.constant dense<0.000000e+00> : vector<4x64xf32>
    %204 = tpu.matmul %203, %201, %cst_145 {dimension_numbers = #tpu.dot_dimension_numbers<[1], [0], [0], [1], [0, 0, 1, 1], [], []>} : vector<4x8xf32>, vector<8x64xf32>, vector<4x64xf32> -> vector<4x64xf32>
    %205 = arith.addf %200, %204 : vector<4x64xf32>
    %206 = vector.extract_strided_slice %187 {offsets = [0, 192], sizes = [8, 64], strides = [1, 1]} : vector<8x576xf32> to vector<8x64xf32>
    %c3_146 = arith.constant 3 : index
    %c0_147 = arith.constant 0 : index
    %c0_148 = arith.constant 0 : index
    %207 = vector.load %arg11[%c3_146, %c0_147, %c0_148] : memref<9x4x8xf32, #tpu.memory_space<vmem>>, vector<1x4x8xf32>
    %208 = vector.shape_cast %207 : vector<1x4x8xf32> to vector<4x8xf32>
    %cst_149 = arith.constant dense<0.000000e+00> : vector<4x64xf32>
    %209 = tpu.matmul %208, %206, %cst_149 {dimension_numbers = #tpu.dot_dimension_numbers<[1], [0], [0], [1], [0, 0, 1, 1], [], []>} : vector<4x8xf32>, vector<8x64xf32>, vector<4x64xf32> -> vector<4x64xf32>
    %210 = arith.addf %205, %209 : vector<4x64xf32>
    %211 = vector.extract_strided_slice %187 {offsets = [0, 256], sizes = [8, 64], strides = [1, 1]} : vector<8x576xf32> to vector<8x64xf32>
    %c4_150 = arith.constant 4 : index
    %c0_151 = arith.constant 0 : index
    %c0_152 = arith.constant 0 : index
    %212 = vector.load %arg11[%c4_150, %c0_151, %c0_152] : memref<9x4x8xf32, #tpu.memory_space<vmem>>, vector<1x4x8xf32>
    %213 = vector.shape_cast %212 : vector<1x4x8xf32> to vector<4x8xf32>
    %cst_153 = arith.constant dense<0.000000e+00> : vector<4x64xf32>
    %214 = tpu.matmul %213, %211, %cst_153 {dimension_numbers = #tpu.dot_dimension_numbers<[1], [0], [0], [1], [0, 0, 1, 1], [], []>} : vector<4x8xf32>, vector<8x64xf32>, vector<4x64xf32> -> vector<4x64xf32>
    %215 = arith.addf %210, %214 : vector<4x64xf32>
    %216 = vector.extract_strided_slice %187 {offsets = [0, 320], sizes = [8, 64], strides = [1, 1]} : vector<8x576xf32> to vector<8x64xf32>
    %c5_154 = arith.constant 5 : index
    %c0_155 = arith.constant 0 : index
    %c0_156 = arith.constant 0 : index
    %217 = vector.load %arg11[%c5_154, %c0_155, %c0_156] : memref<9x4x8xf32, #tpu.memory_space<vmem>>, vector<1x4x8xf32>
    %218 = vector.shape_cast %217 : vector<1x4x8xf32> to vector<4x8xf32>
    %cst_157 = arith.constant dense<0.000000e+00> : vector<4x64xf32>
    %219 = tpu.matmul %218, %216, %cst_157 {dimension_numbers = #tpu.dot_dimension_numbers<[1], [0], [0], [1], [0, 0, 1, 1], [], []>} : vector<4x8xf32>, vector<8x64xf32>, vector<4x64xf32> -> vector<4x64xf32>
    %220 = arith.addf %215, %219 : vector<4x64xf32>
    %221 = vector.extract_strided_slice %187 {offsets = [0, 384], sizes = [8, 64], strides = [1, 1]} : vector<8x576xf32> to vector<8x64xf32>
    %c6_158 = arith.constant 6 : index
    %c0_159 = arith.constant 0 : index
    %c0_160 = arith.constant 0 : index
    %222 = vector.load %arg11[%c6_158, %c0_159, %c0_160] : memref<9x4x8xf32, #tpu.memory_space<vmem>>, vector<1x4x8xf32>
    %223 = vector.shape_cast %222 : vector<1x4x8xf32> to vector<4x8xf32>
    %cst_161 = arith.constant dense<0.000000e+00> : vector<4x64xf32>
    %224 = tpu.matmul %223, %221, %cst_161 {dimension_numbers = #tpu.dot_dimension_numbers<[1], [0], [0], [1], [0, 0, 1, 1], [], []>} : vector<4x8xf32>, vector<8x64xf32>, vector<4x64xf32> -> vector<4x64xf32>
    %225 = arith.addf %220, %224 : vector<4x64xf32>
    %226 = vector.extract_strided_slice %187 {offsets = [0, 448], sizes = [8, 64], strides = [1, 1]} : vector<8x576xf32> to vector<8x64xf32>
    %c7_162 = arith.constant 7 : index
    %c0_163 = arith.constant 0 : index
    %c0_164 = arith.constant 0 : index
    %227 = vector.load %arg11[%c7_162, %c0_163, %c0_164] : memref<9x4x8xf32, #tpu.memory_space<vmem>>, vector<1x4x8xf32>
    %228 = vector.shape_cast %227 : vector<1x4x8xf32> to vector<4x8xf32>
    %cst_165 = arith.constant dense<0.000000e+00> : vector<4x64xf32>
    %229 = tpu.matmul %228, %226, %cst_165 {dimension_numbers = #tpu.dot_dimension_numbers<[1], [0], [0], [1], [0, 0, 1, 1], [], []>} : vector<4x8xf32>, vector<8x64xf32>, vector<4x64xf32> -> vector<4x64xf32>
    %230 = arith.addf %225, %229 : vector<4x64xf32>
    %231 = vector.extract_strided_slice %187 {offsets = [0, 512], sizes = [8, 64], strides = [1, 1]} : vector<8x576xf32> to vector<8x64xf32>
    %c8_166 = arith.constant 8 : index
    %c0_167 = arith.constant 0 : index
    %c0_168 = arith.constant 0 : index
    %232 = vector.load %arg11[%c8_166, %c0_167, %c0_168] : memref<9x4x8xf32, #tpu.memory_space<vmem>>, vector<1x4x8xf32>
    %233 = vector.shape_cast %232 : vector<1x4x8xf32> to vector<4x8xf32>
    %cst_169 = arith.constant dense<0.000000e+00> : vector<4x64xf32>
    %234 = tpu.matmul %233, %231, %cst_169 {dimension_numbers = #tpu.dot_dimension_numbers<[1], [0], [0], [1], [0, 0, 1, 1], [], []>} : vector<4x8xf32>, vector<8x64xf32>, vector<4x64xf32> -> vector<4x64xf32>
    %235 = arith.addf %230, %234 : vector<4x64xf32>
    %c0_170 = arith.constant 0 : index
    %c0_171 = arith.constant 0 : index
    %c0_172 = arith.constant 0 : index
    %236 = vector.load %arg14[%c0_170, %c0_171, %c0_172] : memref<1x4x64xf32, #tpu.memory_space<vmem>>, vector<1x4x64xf32>
    %237 = vector.shape_cast %236 : vector<1x4x64xf32> to vector<4x64xf32>
    %238 = vector.shape_cast %235 : vector<4x64xf32> to vector<1x4x64xf32>
    tpu.vector_store %arg14[%c0_170, %c0_171, %c0_172], %238 {strides = array<i32>} : memref<1x4x64xf32, #tpu.memory_space<vmem>>, vector<1x4x64xf32>,
    return
  }
  func.func @transform_0(%arg0: i32) -> (i32, i32, i32) {
    %c0_i32 = arith.constant 0 : i32
    %c0_i32_0 = arith.constant 0 : i32
    %c0_i32_1 = arith.constant 0 : i32
    return %arg0, %c0_i32, %c0_i32_0 : i32, i32, i32
  }
  func.func @transform_1(%arg0: i32) -> (i32, i32, i32) {
    %c0_i32 = arith.constant 0 : i32
    %c0_i32_0 = arith.constant 0 : i32
    %c0_i32_1 = arith.constant 0 : i32
    %c0_i32_2 = arith.constant 0 : i32
    return %c0_i32, %c0_i32_0, %c0_i32_1 : i32, i32, i32
  }
  func.func @transform_2(%arg0: i32) -> (i32, i32) {
    %c0_i32 = arith.constant 0 : i32
    %c0_i32_0 = arith.constant 0 : i32
    %c0_i32_1 = arith.constant 0 : i32
    return %c0_i32, %c0_i32_0 : i32, i32
  }
  func.func @transform_3(%arg0: i32) -> (i32, i32) {
    %c0_i32 = arith.constant 0 : i32
    %c0_i32_0 = arith.constant 0 : i32
    %c0_i32_1 = arith.constant 0 : i32
    return %c0_i32, %c0_i32_0 : i32, i32
  }
  func.func @transform_4(%arg0: i32) -> (i32, i32, i32) {
    %c0_i32 = arith.constant 0 : i32
    %c0_i32_0 = arith.constant 0 : i32
    %c0_i32_1 = arith.constant 0 : i32
    %c0_i32_2 = arith.constant 0 : i32
    return %c0_i32, %c0_i32_0, %c0_i32_1 : i32, i32, i32
  }
  func.func @transform_5(%arg0: i32) -> (i32, i32) {
    %c0_i32 = arith.constant 0 : i32
    %c0_i32_0 = arith.constant 0 : i32
    %c0_i32_1 = arith.constant 0 : i32
    return %c0_i32, %c0_i32_0 : i32, i32
  }
  func.func @transform_6(%arg0: i32) -> (i32, i32) {
    %c0_i32 = arith.constant 0 : i32
    %c0_i32_0 = arith.constant 0 : i32
    %c0_i32_1 = arith.constant 0 : i32
    return %c0_i32, %c0_i32_0 : i32, i32
  }
  func.func @transform_7(%arg0: i32) -> (i32, i32, i32) {
    %c0_i32 = arith.constant 0 : i32
    %c0_i32_0 = arith.constant 0 : i32
    %c0_i32_1 = arith.constant 0 : i32
    %c0_i32_2 = arith.constant 0 : i32
    return %c0_i32, %c0_i32_0, %c0_i32_1 : i32, i32, i32
  }
  func.func @transform_8(%arg0: i32) -> (i32, i32) {
    %c0_i32 = arith.constant 0 : i32
    %c0_i32_0 = arith.constant 0 : i32
    %c0_i32_1 = arith.constant 0 : i32
    return %c0_i32, %c0_i32_0 : i32, i32
  }
  func.func @transform_9(%arg0: i32) -> (i32, i32) {
    %c0_i32 = arith.constant 0 : i32
    %c0_i32_0 = arith.constant 0 : i32
    %c0_i32_1 = arith.constant 0 : i32
    return %c0_i32, %c0_i32_0 : i32, i32
  }
  func.func @transform_10(%arg0: i32) -> (i32, i32, i32) {
    %c0_i32 = arith.constant 0 : i32
    %c0_i32_0 = arith.constant 0 : i32
    %c0_i32_1 = arith.constant 0 : i32
    %c0_i32_2 = arith.constant 0 : i32
    return %c0_i32, %c0_i32_0, %c0_i32_1 : i32, i32, i32
  }
  func.func @transform_11(%arg0: i32) -> (i32, i32) {
    %c0_i32 = arith.constant 0 : i32
    %c0_i32_0 = arith.constant 0 : i32
    %c0_i32_1 = arith.constant 0 : i32
    return %c0_i32, %c0_i32_0 : i32, i32
  }
  func.func @transform_12(%arg0: i32) -> (i32, i32) {
    %c0_i32 = arith.constant 0 : i32
    %c0_i32_0 = arith.constant 0 : i32
    %c0_i32_1 = arith.constant 0 : i32
    return %c0_i32, %c0_i32_0 : i32, i32
  }
  func.func @transform_13(%arg0: i32) -> (i32, i32, i32) {
    %c0_i32 = arith.constant 0 : i32
    %c0_i32_0 = arith.constant 0 : i32
    %c0_i32_1 = arith.constant 0 : i32
    return %arg0, %c0_i32, %c0_i32_0 : i32, i32, i32
  }
}

</mosaic_0001>

<bundles_post_ra>
// kernel: forward.1
= control target key start
LH: loop header
LB: loop body
LE: loop exit
PB: predicated region body
PF: predicated region fallthrough
CT: control target
= control target key end

     0   :  { %s8042_s0 = inlined_call_operand.vmem [shape: f32[2,4,256], index: 0, kind: input, shape index: {}]   ;;  %s8043_s1 = inlined_call_operand.vmem [shape: f32[9,8,4], index: 1, kind: input, shape index: {}]   ;;  %s8044_s2 = inlined_call_operand.vmem [shape: f32[8,1], index: 2, kind: input, shape index: {}]   ;;  %s8045_s3 = inlined_call_operand.vmem [shape: s32[1,576], index: 3, kind: input, shape index: {}]   ;;  %s8046_s4 = inlined_call_operand.hbm [shape: f32[9,4,8], index: 4, kind: input, shape index: {}]   ;;  %s8047_s5 = inlined_call_operand.hbm [shape: f32[4,1], index: 5, kind: input, shape index: {}]   ;;  %s8048_s6 = inlined_call_operand.vmem [shape: s32[1,576], index: 6, kind: input, shape index: {}, may-alias: {6,9,12}]   ;;  %s8049_s7 = inlined_call_operand.vmem [shape: f32[9,8,4], index: 7, kind: input, shape index: {}]   ;;  %s8050_s8 = inlined_call_operand.hbm [shape: f32[8,1], index: 8, kind: input, shape index: {}]   ;;  %s8051_s9 = inlined_call_operand.vmem [shape: s32[1,576], index: 9, kind: input, shape index: {}, may-alias: {6,9,12}]   ;;  %s8052_s10 = inlined_call_operand.hbm [shape: f32[9,4,8], index: 10, kind: input, shape index: {}]   ;;  %s8053_s11 = inlined_call_operand.hbm [shape: f32[4,1], index: 11, kind: input, shape index: {}]   ;;  %s8054_s12 = inlined_call_operand.vmem [shape: s32[1,576], index: 12, kind: input, shape index: {}, may-alias: {6,9,12}]   ;;  %s8055_s13 = inlined_call_operand.vmem [shape: f32[2,4,64], index: 13, kind: output, shape index: {}]  }
   0x1   :  { %8064 = sst [smem:[#allocation14_spill]] %s8047_s5 }
   0x2   :  { %18 = vsyncpa [#allocation3], 0 }
   0x3   :  { %19 = vsyncpa [#allocation5], 0 }
   0x4   :  { %20 = vsyncpa [#allocation8], 0  ;;  %s6431_s25 = smov 0  }
   0x5 LB: > { %8065 = sst [smem:[#allocation13_spill]] %s6346_s25  ;;  %s6348_s26 = smov [#allocation4]   ;;  %s6346_s25 = sphi %s6431_s25, %s26_s25  }
   0x6   : > { %s370_s27 = sshll.u32 %s6348_s26, 4  ;;  %s6437_s28 = sadd.s32 4294967295, %s6346_s25   ;;  %s6442_s27 = int_to_ptr.vmem [resolvable:$true] %s370_s27 }
   0x7   : > { %p5010_p0 = scmp.ge.s32.totalorder %s6346_s25, 1  ;;  %p335_p1 = scmp.lt.s32.totalorder %s6346_s25, 3 }
   0x8   : > { %p8057_p2 = scmp.eq.s32.totalorder %s6437_s28, 0  ;;  %s6349_s30 = smov [#allocation7]  }
   0x9   : > { %p6444_p3 = pnand %p5010_p0, %p335_p1  ;;  %s400_s14 = sshll.u32 %s6349_s30, 4  ;;  %s6450_s14 = int_to_ptr.vmem [resolvable:$true] %s400_s14 }
   0xa   : > { %s6350_s16 = smov [#allocation2]   ;;  %s6351_s18 = smov [#allocation6]  }
   0xb   : > { %s8066_s29 = scalar_select %p6444_p3, 1, 0 }
   0xc   : > { %p6138_p4 = pneg %p6444_p3  ;;  %s356_s17 = sshll.u32 %s6350_s16, 4  ;;  %s6458_s17 = int_to_ptr.vmem [resolvable:$true] %s356_s17 }
   0xd   : > { %s6460_s19 = sshll.u32 %s6351_s18, 4  ;;  %s8068_s5 = sld [smem:[#allocation14_spill]]  ;;  %s388_s19 = int_to_ptr.vmem [resolvable:$true] %s6460_s19 }
   0xe   : > { %p6454_p5 = pnand %p8057_p2, %p6138_p4 }
  0x10   : > { %p6470_p7 = pneg %p6454_p5 }
  0x13   : > { %s6188_s22 = scalar_lea.hbm %s8068_s5, 64 }
  0x14   : > { %p6189_p6 = scmp.ne.s32.totalorder %s8068_s5, %s6188_s22  ;;  %p6195_p10 = scmp.lt.u32.totalorder %s6188_s22, %s8068_s5 }
  0x16   : > { %p6191_p8 = pnand %p6470_p7, %p6189_p6 }
  0x18   : > { %p6192_p9 = pneg %p6191_p8 }
  0x1a   : > { %p6197_p11 = pnand %p6195_p10, %p6192_p9 }
  0x1c   : > { %6200 = shalt.err (!%p6197_p11)
}
  0x1d   : > { %s6201_s18 = scalar_lea.vmem %s6442_s27, 64  ;;  %p6209_p1 = scmp.lt.s32.totalorder %s6442_s27, %s6442_s27 }
  0x1e   : > { %p6202_p12 = scmp.ne.s32.totalorder %s6442_s27, %s6201_s18  ;;  %p6210_p4 = scmp.lt.s32.totalorder %s6201_s18, %s6201_s18 }
  0x20   : > { %p6204_p13 = pnand %p6202_p12, %p6470_p7  ;;  %p6211_p6 = por %p6210_p4, %p6209_p1 }
  0x22   : > { %p6205_p0 = pneg %p6204_p13 }
  0x24   : > { %p6212_p8 = pnand %p6211_p6, %p6205_p0 }
  0x26   : > { %6215 = shalt.err (!%p6212_p8)
}
  0x27   : > { %6144 = dma.hbm_to_vmem [thread:$0]  (!%p6454_p5), %s8068_s5, 64, %s6442_s27, [#allocation5]  }
  0x28   : > { %s6216_s24 = scalar_lea.hbm %s8052_s10, 576 }
  0x29   : > { %p6217_p9 = scmp.ne.s32.totalorder %s8052_s10, %s6216_s24  ;;  %p6223_p12 = scmp.lt.u32.totalorder %s6216_s24, %s8052_s10 }
  0x2b   : > { %p6219_p10 = pnand %p6217_p9, %p6470_p7 }
  0x2d   : > { %p6220_p11 = pneg %p6219_p10 }
  0x2f   : > { %p6225_p13 = pnand %p6223_p12, %p6220_p11 }
  0x31   : > { %6228 = shalt.err (!%p6225_p13)
}
  0x32   : > { %s6229_s27 = scalar_lea.vmem %s6450_s14, 576  ;;  %p6237_p6 = scmp.lt.s32.totalorder %s6450_s14, %s6450_s14 }
  0x33   : > { %p6230_p0 = scmp.ne.s32.totalorder %s6450_s14, %s6229_s27  ;;  %p6238_p8 = scmp.lt.s32.totalorder %s6229_s27, %s6229_s27 }
  0x35   : > { %p6232_p1 = pnand %p6230_p0, %p6470_p7  ;;  %p6239_p9 = por %p6238_p8, %p6237_p6 }
  0x37   : > { %p6233_p4 = pneg %p6232_p1 }
  0x39   : > { %p6240_p10 = pnand %p6239_p9, %p6233_p4 }
  0x3b   : > { %6243 = shalt.err (!%p6240_p10)
}
  0x3c   : > { %s6352_s20 = smov 64   ;;  %s6353_s25 = smov 4  }
  0x3d   : > { %6150 = dma.hbm_to_vmem [thread:$0]  (!%p6454_p5), %s8052_s10, 576, %s6450_s14, [#allocation8], %s6352_s20, %s6352_s20, %s6353_s25  }
  0x3e   : > { %s6244_s30 = scalar_lea.hbm %s8046_s4, 576 }
  0x3f   : > { %p6245_p11 = scmp.ne.s32.totalorder %s8046_s4, %s6244_s30  ;;  %p6251_p0 = scmp.lt.u32.totalorder %s6244_s30, %s8046_s4 }
  0x41   : > { %p6247_p12 = pnand %p6245_p11, %p6470_p7 }
  0x43   : > { %p6248_p13 = pneg %p6247_p12 }
  0x45   : > { %p6253_p1 = pnand %p6251_p0, %p6248_p13 }
  0x47   : > { %6256 = shalt.err (!%p6253_p1)
}
  0x48   : > { %s6257_s14 = scalar_lea.vmem %s6458_s17, 576  ;;  %p6265_p9 = scmp.lt.s32.totalorder %s6458_s17, %s6458_s17 }
  0x49   : > { %p6258_p4 = scmp.ne.s32.totalorder %s6458_s17, %s6257_s14  ;;  %p6266_p10 = scmp.lt.s32.totalorder %s6257_s14, %s6257_s14 }
  0x4b   : > { %p6260_p6 = pnand %p6258_p4, %p6470_p7  ;;  %p6267_p11 = por %p6266_p10, %p6265_p9 }
  0x4d   : > { %p6261_p8 = pneg %p6260_p6 }
  0x4f   : > { %p6268_p12 = pnand %p6267_p11, %p6261_p8 }
  0x51   : > { %6271 = shalt.err (!%p6268_p12)
}
  0x52   : > { %6141 = dma.hbm_to_vmem [thread:$0]  (!%p6454_p5), %s8046_s4, 576, %s6458_s17, [#allocation3], %s6352_s20, %s6352_s20, %s6353_s25  }
  0x53   : > { %s6272_s24 = scalar_lea.hbm %s8050_s8, 128 }
  0x54   : > { %p6273_p13 = scmp.ne.s32.totalorder %s8050_s8, %s6272_s24  ;;  %p6279_p4 = scmp.lt.u32.totalorder %s6272_s24, %s8050_s8 }
  0x56   : > { %p6275_p0 = pnand %p6273_p13, %p6470_p7 }
  0x58   : > { %p6276_p1 = pneg %p6275_p0 }
  0x5a   : > { %p6281_p6 = pnand %p6279_p4, %p6276_p1 }
  0x5c   : > { %6284 = shalt.err (!%p6281_p6)
}
  0x5d   : > { %s6285_s14 = scalar_lea.vmem %s388_s19, 128  ;;  %p6293_p11 = scmp.lt.s32.totalorder %s388_s19, %s388_s19 }
  0x5e   : > { %p6286_p8 = scmp.ne.s32.totalorder %s388_s19, %s6285_s14  ;;  %p6294_p12 = scmp.lt.s32.totalorder %s6285_s14, %s6285_s14 }
  0x60   : > { %p6288_p9 = pnand %p6286_p8, %p6470_p7  ;;  %p6295_p2 = por %p6294_p12, %p6293_p11 }
  0x62   : > { %p6289_p10 = pneg %p6288_p9 }
  0x64   : > { %p6296_p3 = pnand %p6295_p2, %p6289_p10 }
  0x66   : > { %6299 = shalt.err (!%p6296_p3)
}
  0x67   : > { %6147 = dma.hbm_to_vmem [thread:$0]  (!%p6454_p5), %s8050_s8, 128, %s388_s19, [#allocation5]  }
  0x68   : > { %s6354_s25 = smov [#allocation9]   ;;  %s6300_s23 = scalar_lea.hbm %s8053_s11, 64 }
  0x69   : > { %s414_s5 = sshll.u32 %s6354_s25, 4  ;;  %p6301_p13 = scmp.ne.s32.totalorder %s8053_s11, %s6300_s23  ;;  %s415_s5 = int_to_ptr.vmem [resolvable:$true] %s414_s5 }
  0x6a   : > { %p6307_p0 = scmp.lt.u32.totalorder %s6300_s23, %s8053_s11 }
  0x6b   : > { %p6303_p2 = pnand %p6301_p13, %p6470_p7 }
  0x6d   : > { %p6304_p3 = pneg %p6303_p2 }
  0x6f   : > { %p6309_p1 = pnand %p6307_p0, %p6304_p3 }
  0x71   : > { %6312 = shalt.err (!%p6309_p1)
}
  0x72   : > { %s6313_s19 = scalar_lea.vmem %s415_s5, 64  ;;  %p6321_p9 = scmp.lt.s32.totalorder %s415_s5, %s415_s5 }
  0x73   : > { %p6314_p4 = scmp.ne.s32.totalorder %s415_s5, %s6313_s19  ;;  %p6322_p10 = scmp.lt.s32.totalorder %s6313_s19, %s6313_s19 }
  0x75   : > { %p6316_p6 = pnand %p6314_p4, %p6470_p7  ;;  %p6323_p11 = por %p6322_p10, %p6321_p9 }
  0x77   : > { %p6317_p8 = pneg %p6316_p6 }
  0x79   : > { %p6324_p12 = pnand %p6323_p11, %p6317_p8 }
  0x7b   : > { %6327 = shalt.err (!%p6324_p12)
}
  0x7c   : > { %6153 = dma.hbm_to_vmem [thread:$0]  (!%p6454_p5), %s8053_s11, 64, %s415_s5, [#allocation8]  }
  0x7d   : > { %p8070_p13 = scmp.ne.s32.totalorder %s8066_s29, 0 }
  0x7e   : > { %p8071_p2 = scmp.eq.s32.totalorder (!%p8070_p13), %s6437_s28, 0 }
  0x7f   : > { %438 = sbr.rel (%p8070_p13) target bundleno = 2619 (0xa3b), region = 72 }
  0x86   : > { %6333 = dma.done.wait (%p8071_p2), [#allocation3], 576   ;;  %p8072_p7 = pmov %p8071_p2 }
  0x87   : > { %p8073_p3 = pmov %p8071_p2 }
  0x88   : > { %6335 = vsyncadd (%p8072_p7), [#allocation3], 4294966720 }
  0x89   : > { %6337 = dma.done.wait (%p8073_p3), [#allocation5], 192   ;;  %p8074_p0 = pmov %p8071_p2 }
  0x8b   : > { %6339 = vsyncadd (%p8074_p0), [#allocation5], 4294967104  ;;  %p8075_p1 = pmov %p8074_p0 }
  0x8c   : > { %p8076_p5 = pmov %p8074_p0 }
  0x8d   : > { %6341 = dma.done.wait (%p8075_p1), [#allocation8], 640  }
  0x8e   : > { %6343 = vsyncadd (%p8076_p5), [#allocation8], 4294966656  ;;  %v508_v0 = vlaneseq  ;;  %v6602_v5 = vld [vmem:[%s8045_s3] sm:$0x1f]  ;;  %v6355_v12 = vmov 1.0|1.0  }
  0x8f   : > { %p497_p4 = scmp.lt.s32.totalorder %s6437_s28, 1  ;;  %v8111_v54 = vmov 0  ;;  %v8122_v24 = vmov 0  ;;  %v8125_v25 = vmov 0  ;;  %v8130_v30 = vmov 0  ;;  %s6358_s22 = smov 64  }
  0x90   : > { %v6588_v1 = vshrl.u32 %v508_v0, 7  ;;  %v8150_v40 = vmov 0  ;;  %v7496_v43 = vld [vmem:[%s8048_s6] sm:$0x1f]  ;;  %v5206_v57 = vld [vmem:[%s8043_s1 + $0x38] sm:$0xff] }
  0x91   : > { %s8204_s28 = smov (!%p497_p4, %s6437_s28), 1  ;;  %v5209_v59 = vld [vmem:[%s8043_s1 + $0x40] sm:$0xff] }
  0x92   : > { %v6591_v2 = vsub.s32 1, %v6588_v1  ;;  %v6594_v3 = vsub.s32 0, %v6588_v1  ;;  %v6597_v4 = vadd.s32 8, %v6588_v1  ;;  %v6605_v6 = vadd.s32 16, %v6588_v1  ;;  %s5387_s26 = sshll.u32 %s8204_s28, 3 }
  0x93   : > { %v6608_v7 = vadd.s32 24, %v6588_v1  ;;  %v6619_v10 = vadd.s32 32, %v6588_v1  ;;  %v6622_v11 = vadd.s32 40, %v6588_v1  ;;  %v6646_v13 = vadd.s32 48, %v6588_v1  ;;  %s501_s25 = scalar_lea.vmem %s8042_s0, %s5387_s26  ;;  %v2137_v36 = vld [vmem:[#allocation4] sm:$0xf] }
  0x94   : > { %v6612_v8 = vrot.slane %v6602_v5, %v6591_v2  ;;  %v6616_v9 = vrot.slane %v6602_v5, %v6594_v3  ;;  %v6649_v14 = vadd.s32 56, %v6588_v1  ;;  %v6654_v15 = vadd.s32 64, %v6588_v1  ;;  %v6893_v44 = vld [vmem:[%s501_s25] sm:$0xff] }
  0x95   : > { %v6657_v16 = vadd.s32 72, %v6588_v1  ;;  %v6664_v17 = vsub.s32 3, %v6588_v1  ;;  %v6671_v18 = vadd.s32 80, %v6588_v1  ;;  %v6674_v19 = vadd.s32 88, %v6588_v1 }
  0x96   : > { %vm562_vm0 = vcmp.eq.s32.totalorder %v6588_v1, %v6612_v8  ;;  %vm567_vm1 = vcmp.eq.s32.totalorder %v6597_v4, %v6612_v8  ;;  %vm561_vm2 = vcmp.eq.s32.totalorder %v6588_v1, %v6616_v9  ;;  %vm566_vm3 = vcmp.eq.s32.totalorder %v6597_v4, %v6616_v9 }
  0x97   : > { %vm5759_vm4 = vmpackc.low %vm567_vm1, %vm562_vm0  ;;  %vm572_vm5 = vcmp.eq.s32.totalorder %v6605_v6, %v6612_v8  ;;  %vm577_vm6 = vcmp.eq.s32.totalorder %v6608_v7, %v6612_v8  ;;  %vm571_vm7 = vcmp.eq.s32.totalorder %v6605_v6, %v6616_v9  ;;  %vm576_vm8 = vcmp.eq.s32.totalorder %v6608_v7, %v6616_v9 }
  0x98   : > { %5760 = vmatprep.subr.msk.bf16.mxu0 %vm5759_vm4, %v6355_v12  ;;  %vm5761_vm9 = vmpackc.low %vm566_vm3, %vm561_vm2  ;;  %vm582_vm10 = vcmp.eq.s32.totalorder %v6619_v10, %v6612_v8  ;;  %vm587_vm11 = vcmp.eq.s32.totalorder %v6622_v11, %v6612_v8  ;;  %vm581_vm15 = vcmp.eq.s32.totalorder %v6619_v10, %v6616_v9  ;;  %vm586_vm0 = vcmp.eq.s32.totalorder %v6622_v11, %v6616_v9 }
  0x99   : > { %5762 = vmatpush1.bf16.msk.msra.mxu0 %vm5761_vm9, %v6355_v12  ;;  %vm5763_vm12 = vmpackc.low %vm577_vm6, %vm572_vm5  ;;  %vm592_vm1 = vcmp.eq.s32.totalorder %v6646_v13, %v6612_v8  ;;  %vm597_vm2 = vcmp.eq.s32.totalorder %v6649_v14, %v6612_v8  ;;  %vm591_vm3 = vcmp.eq.s32.totalorder %v6646_v13, %v6616_v9  ;;  %vm596_vm4 = vcmp.eq.s32.totalorder %v6649_v14, %v6616_v9 }
  0x9a   : > { %5764 = vmatprep.subr.msk.bf16.mxu0 %vm5763_vm12, %v6355_v12  ;;  %vm5765_vm13 = vmpackc.low %vm576_vm8, %vm571_vm7  ;;  %v6682_v20 = vsub.s32 2, %v6588_v1  ;;  %vm602_vm6 = vcmp.eq.s32.totalorder %v6654_v15, %v6612_v8  ;;  %vm607_vm7 = vcmp.eq.s32.totalorder %v6657_v16, %v6612_v8  ;;  %v6690_v21 = vadd.s32 96, %v6588_v1 }
  0x9b   : > { %vm5767_vm14 = vmpackc.low %vm587_vm11, %vm582_vm10  ;;  %v6693_v22 = vadd.s32 104, %v6588_v1  ;;  %vm601_vm9 = vcmp.eq.s32.totalorder %v6654_v15, %v6616_v9  ;;  %vm606_vm10 = vcmp.eq.s32.totalorder %v6657_v16, %v6616_v9  ;;  %v6701_v23 = vrot.slane %v6602_v5, %v6664_v17 }
  0x9c   : > { %vm5769_vm5 = vmpackc.low %vm586_vm0, %vm581_vm15  ;;  %vm612_vm12 = vcmp.eq.s32.totalorder %v6671_v18, %v6612_v8  ;;  %vm611_vm15 = vcmp.eq.s32.totalorder %v6671_v18, %v6616_v9  ;;  %vm616_vm0 = vcmp.eq.s32.totalorder %v6674_v19, %v6616_v9  ;;  %v6722_v26 = vrot.slane %v6602_v5, %v6682_v20 }
  0x9d   : > { %5766 = vmatpush1.bf16.msk.msra.mxu0 %vm5765_vm13, %v6355_v12  ;;  %vm5771_vm8 = vmpackc.low %vm597_vm2, %vm592_vm1  ;;  %vm617_vm13 = vcmp.eq.s32.totalorder %v6674_v19, %v6612_v8  ;;  %vm622_vm2 = vcmp.eq.s32.totalorder %v6690_v21, %v6612_v8  ;;  %v6734_v28 = vadd.s32 112, %v6588_v1  ;;  %v6737_v29 = vadd.s32 120, %v6588_v1 }
  0x9e   : > { %5768 = vmatprep.subr.msk.bf16.mxu0 %vm5767_vm14, %v6355_v12  ;;  %vm6703_vm11 = vmpackc.low %vm596_vm4, %vm591_vm3  ;;  %vm627_vm3 = vcmp.eq.s32.totalorder %v6693_v22, %v6612_v8  ;;  %v6775_v33 = vadd.s32 128, %v6588_v1  ;;  %v6778_v34 = vadd.s32 136, %v6588_v1  ;;  %v6821_v37 = vadd.s32 144, %v6588_v1 }
  0x9f   : > { %vm6712_vm14 = vmpackc.low %vm607_vm7, %vm602_vm6  ;;  %vm569_vm6 = vcmp.eq.s32.totalorder %v6597_v4, %v6701_v23  ;;  %v6824_v38 = vadd.s32 152, %v6588_v1  ;;  %v6869_v41 = vadd.s32 160, %v6588_v1  ;;  %v6872_v42 = vadd.s32 168, %v6588_v1 }
  0xa0   : > { %vm6725_vm1 = vmpackc.low %vm606_vm10, %vm601_vm9  ;;  %vm626_vm9 = vcmp.eq.s32.totalorder %v6693_v22, %v6616_v9  ;;  %v6915_v46 = vadd.s32 176, %v6588_v1  ;;  %v6918_v47 = vadd.s32 184, %v6588_v1  ;;  %v6934_v49 = vcombine.high %v6893_v44, %v6893_v44 }
  0xa1   : > { %5770 = vmatpush1.bf16.msk.msra.mxu0 %vm5769_vm5, %v6355_v12  ;;  %vm6740_vm4 = vmpackc.low %vm617_vm13, %vm612_vm12  ;;  %vm564_vm5 = vcmp.eq.s32.totalorder %v6588_v1, %v6701_v23  ;;  %vm563_vm12 = vcmp.eq.s32.totalorder %v6588_v1, %v6722_v26  ;;  %vm568_vm13 = vcmp.eq.s32.totalorder %v6597_v4, %v6722_v26  ;;  %v6963_v51 = vadd.s32 192, %v6588_v1 }
  0xa2   : > { %5772 = vmatprep.subr.msk.bf16.mxu0 %vm5771_vm8, %v6355_v12  ;;  %vm6748_vm7 = vmpackc.low %vm616_vm0, %vm611_vm15  ;;  %vm621_vm8 = vcmp.eq.s32.totalorder %v6690_v21, %v6616_v9  ;;  %vm632_vm15 = vcmp.eq.s32.totalorder %v6734_v28, %v6612_v8  ;;  %v6966_v52 = vadd.s32 200, %v6588_v1  ;;  %948 = vmatprep.mubr.f32.mxu0 %v6934_v49  ;;  %v7012_v55 = vadd.s32 208, %v6588_v1 }
  0xa3   : > { %vm6759_vm10 = vmpackc.low %vm627_vm3, %vm622_vm2  ;;  %vm579_vm3 = vcmp.eq.s32.totalorder %v6608_v7, %v6701_v23  ;;  %1019 = vmatprep.mubr.f32.mxu1 %v6934_v49  ;;  %v7015_v56 = vadd.s32 216, %v6588_v1  ;;  %v7034_v58 = vsub.s32 4, %v6588_v1  ;;  %v7049_v60 = vadd.s32 224, %v6588_v1 }
  0xa4   : > { %vm5823_vm0 = vmpackc.low %vm569_vm6, %vm564_vm5  ;;  %vm636_vm6 = vcmp.eq.s32.totalorder %v6737_v29, %v6616_v9  ;;  %vm578_vm5 = vcmp.eq.s32.totalorder %v6608_v7, %v6722_v26  ;;  %v7062_v61 = vadd.s32 232, %v6588_v1  ;;  %v7160_v27 = vadd.s32 248, %v6588_v1 }
  0xa5   : > { %5774 = vmatpush1.bf16.msk.msra.mxu0 %vm6703_vm11, %v6355_v12  ;;  %vm637_vm11 = vcmp.eq.s32.totalorder %v6737_v29, %v6612_v8  ;;  %vm6785_vm2 = vmpackc.low %vm626_vm9, %vm621_vm8  ;;  %5824 = vmatprep.subr.msk.bf16.mxu1 %vm5823_vm0, %v6355_v12  ;;  %vm573_vm0 = vcmp.eq.s32.totalorder %v6605_v6, %v6722_v26  ;;  %v7084_v63 = vrot.slane %v6602_v5, %v7034_v58  ;;  %v7109_v5 = vadd.s32 240, %v6588_v1 }
  0xa6   : > { %5776 = vmatprep.subr.msk.bf16.mxu0 %vm6712_vm14, %v6355_v12  ;;  %vm574_vm14 = vcmp.eq.s32.totalorder %v6605_v6, %v6701_v23  ;;  %vm5825_vm8 = vmpackc.low %vm568_vm13, %vm563_vm12  ;;  %vm642_vm12 = vcmp.eq.s32.totalorder %v6775_v33, %v6612_v8  ;;  %v7500_v45 = vrot.slane %v7496_v43, %v6591_v2  ;;  %v1832_v62 = vrot.slane %v7496_v43, %v6682_v20 }
  0xa7   : > { %vm6804_vm9 = vmpackc.low %vm637_vm11, %vm632_vm15  ;;  %5826 = vmatpush1.bf16.msk.msra.mxu1 %vm5825_vm8, %v6355_v12  ;;  %vm8093_vm15 = vcmp.eq.s32.totalorder %v6734_v28, %v6616_v9  ;;  %vm646_vm8 = vcmp.eq.s32.totalorder %v6778_v34, %v6616_v9 }
  0xa8   : > { %vm5827_vm13 = vmpackc.low %vm579_vm3, %vm574_vm14  ;;  %vm589_vm14 = vcmp.eq.s32.totalorder %v6622_v11, %v6701_v23  ;;  %vm588_vm3 = vcmp.eq.s32.totalorder %v6622_v11, %v6722_v26 }
  0xa9   : > { %5778 = vmatpush1.bf16.msk.msra.mxu0 %vm6725_vm1, %v6355_v12  ;;  %vm647_vm1 = vcmp.eq.s32.totalorder %v6778_v34, %v6612_v8  ;;  %vm6830_vm11 = vmpackc.low %vm636_vm6, %vm8093_vm15  ;;  %5828 = vmatprep.subr.msk.bf16.mxu1 %vm5827_vm13, %v6355_v12  ;;  %vm583_vm15 = vcmp.eq.s32.totalorder %v6619_v10, %v6722_v26 }
  0xaa   : > { %5780 = vmatprep.subr.msk.bf16.mxu0 %vm6740_vm4, %v6355_v12  ;;  %vm584_vm4 = vcmp.eq.s32.totalorder %v6619_v10, %v6701_v23  ;;  %vm5829_vm6 = vmpackc.low %vm578_vm5, %vm573_vm0  ;;  %vm657_vm5 = vcmp.eq.s32.totalorder %v6824_v38, %v6612_v8 }
  0xab   : > { %vm6849_vm13 = vmpackc.low %vm647_vm1, %vm642_vm12  ;;  %5830 = vmatpush1.bf16.msk.msra.mxu1 %vm5829_vm6, %v6355_v12  ;;  %vm8098_vm12 = vcmp.eq.s32.totalorder %v6775_v33, %v6616_v9  ;;  %vm656_vm6 = vcmp.eq.s32.totalorder %v6824_v38, %v6616_v9 }
  0xac   : > { %vm5831_vm0 = vmpackc.low %vm589_vm14, %vm584_vm4  ;;  %vm599_vm4 = vcmp.eq.s32.totalorder %v6649_v14, %v6701_v23  ;;  %vm598_vm14 = vcmp.eq.s32.totalorder %v6649_v14, %v6722_v26 }
  0xad   : > { %5782 = vmatpush1.bf16.msk.msra.mxu0 %vm6748_vm7, %v6355_v12  ;;  %vm652_vm7 = vcmp.eq.s32.totalorder %v6821_v37, %v6612_v8  ;;  %vm6877_vm1 = vmpackc.low %vm646_vm8, %vm8098_vm12  ;;  %5832 = vmatprep.subr.msk.bf16.mxu1 %vm5831_vm0, %v6355_v12  ;;  %vm593_vm12 = vcmp.eq.s32.totalorder %v6646_v13, %v6722_v26 }
  0xae   : > { %5784 = vmatprep.subr.msk.bf16.mxu0 %vm6759_vm10, %v6355_v12  ;;  %vm594_vm10 = vcmp.eq.s32.totalorder %v6646_v13, %v6701_v23  ;;  %vm5833_vm8 = vmpackc.low %vm588_vm3, %vm583_vm15  ;;  %vm662_vm3 = vcmp.eq.s32.totalorder %v6869_v41, %v6612_v8 }
  0xaf   : > { %vm6898_vm0 = vmpackc.low %vm657_vm5, %vm652_vm7  ;;  %5834 = vmatpush1.bf16.msk.msra.mxu1 %vm5833_vm8, %v6355_v12  ;;  %vm8103_vm7 = vcmp.eq.s32.totalorder %v6821_v37, %v6616_v9 }
  0xb0   : > { %vm5835_vm15 = vmpackc.low %vm599_vm4, %vm594_vm10  ;;  %vm609_vm10 = vcmp.eq.s32.totalorder %v6657_v16, %v6701_v23  ;;  %vm608_vm4 = vcmp.eq.s32.totalorder %v6657_v16, %v6722_v26 }
  0xb1   : > { %5786 = vmatpush1.bf16.msk.msra.mxu0 %vm6785_vm2, %v6355_v12  ;;  %vm667_vm2 = vcmp.eq.s32.totalorder %v6872_v42, %v6612_v8  ;;  %vm6923_vm5 = vmpackc.low %vm656_vm6, %vm8103_vm7  ;;  %5836 = vmatprep.subr.msk.bf16.mxu1 %vm5835_vm15, %v6355_v12  ;;  %vm666_vm6 = vcmp.eq.s32.totalorder %v6872_v42, %v6616_v9  ;;  %vm603_vm7 = vcmp.eq.s32.totalorder %v6654_v15, %v6722_v26 }
  0xb2   : > { %5788 = vmatprep.subr.msk.bf16.mxu0 %vm6804_vm9, %v6355_v12  ;;  %vm604_vm9 = vcmp.eq.s32.totalorder %v6654_v15, %v6701_v23  ;;  %vm5837_vm8 = vmpackc.low %vm598_vm14, %vm593_vm12  ;;  %vm672_vm14 = vcmp.eq.s32.totalorder %v6915_v46, %v6612_v8 }
  0xb3   : > { %vm6946_vm15 = vmpackc.low %vm667_vm2, %vm662_vm3  ;;  %5838 = vmatpush1.bf16.msk.msra.mxu1 %vm5837_vm8, %v6355_v12  ;;  %vm8108_vm3 = vcmp.eq.s32.totalorder %v6869_v41, %v6616_v9  ;;  %vm676_vm8 = vcmp.eq.s32.totalorder %v6918_v47, %v6616_v9 }
  0xb4   : > { %vm5839_vm12 = vmpackc.low %vm609_vm10, %vm604_vm9  ;;  %vm619_vm9 = vcmp.eq.s32.totalorder %v6674_v19, %v6701_v23  ;;  %vm671_vm10 = vcmp.eq.s32.totalorder %v6915_v46, %v6616_v9 }
  0xb5   : > { %5790 = vmatpush1.bf16.msk.msra.mxu0 %vm6830_vm11, %v6355_v12  ;;  %vm677_vm11 = vcmp.eq.s32.totalorder %v6918_v47, %v6612_v8  ;;  %vm6972_vm2 = vmpackc.low %vm666_vm6, %vm8108_vm3  ;;  %5840 = vmatprep.subr.msk.bf16.mxu1 %vm5839_vm12, %v6355_v12  ;;  %vm613_vm3 = vcmp.eq.s32.totalorder %v6671_v18, %v6722_v26 }
  0xb6   : > { %5792 = vmatprep.subr.msk.bf16.mxu0 %vm6849_vm13, %v6355_v12  ;;  %vm614_vm13 = vcmp.eq.s32.totalorder %v6671_v18, %v6701_v23  ;;  %vm5841_vm6 = vmpackc.low %vm608_vm4, %vm603_vm7  ;;  %vm618_vm4 = vcmp.eq.s32.totalorder %v6674_v19, %v6722_v26  ;;  %vm687_vm7 = vcmp.eq.s32.totalorder %v6966_v52, %v6612_v8 }
  0xb7   : > { %vm6995_vm12 = vmpackc.low %vm677_vm11, %vm672_vm14  ;;  %5842 = vmatpush1.bf16.msk.msra.mxu1 %vm5841_vm6, %v6355_v12  ;;  %vm686_vm6 = vcmp.eq.s32.totalorder %v6966_v52, %v6616_v9 }
  0xb8   : > { %v8112_v54 = vsel %vm6995_vm12, 4294967295, %v8111_v54  ;;  %vm5843_vm14 = vmpackc.low %vm619_vm9, %vm614_vm13  ;;  %vm629_vm13 = vcmp.eq.s32.totalorder %v6693_v22, %v6701_v23  ;;  %vm681_vm9 = vcmp.eq.s32.totalorder %v6963_v51, %v6616_v9 }
  0xb9   : > { %5794 = vmatpush1.bf16.msk.msra.mxu0 %vm6877_vm1, %v6355_v12  ;;  %vm682_vm1 = vcmp.eq.s32.totalorder %v6963_v51, %v6612_v8  ;;  %vm7020_vm11 = vmpackc.low %vm676_vm8, %vm671_vm10  ;;  %5844 = vmatprep.subr.msk.bf16.mxu1 %vm5843_vm14, %v6355_v12  ;;  %vm623_vm8 = vcmp.eq.s32.totalorder %v6690_v21, %v6722_v26  ;;  %vm628_vm14 = vcmp.eq.s32.totalorder %v6693_v22, %v6722_v26 }
  0xba   : > { %5796 = vmatprep.subr.msk.bf16.mxu0 %vm6898_vm0, %v6355_v12  ;;  %vm624_vm0 = vcmp.eq.s32.totalorder %v6690_v21, %v6701_v23  ;;  %vm5845_vm12 = vmpackc.low %vm618_vm4, %vm613_vm3  ;;  %vm697_vm3 = vcmp.eq.s32.totalorder %v7015_v56, %v6612_v8 }
  0xbb   : > { %vm7039_vm10 = vmpackc.low %vm687_vm7, %vm682_vm1  ;;  %5846 = vmatpush1.bf16.msk.msra.mxu1 %vm5845_vm12, %v6355_v12  ;;  %vm639_vm1 = vcmp.eq.s32.totalorder %v6737_v29, %v6701_v23  ;;  %vm691_vm7 = vcmp.eq.s32.totalorder %v7012_v55, %v6616_v9 }
  0xbc   : > { %vm5847_vm12 = vmpackc.low %vm629_vm13, %vm624_vm0  ;;  %vm696_vm0 = vcmp.eq.s32.totalorder %v7015_v56, %v6616_v9 }
  0xbd   : > { %5798 = vmatpush1.bf16.msk.msra.mxu0 %vm6923_vm5, %v6355_v12  ;;  %vm692_vm5 = vcmp.eq.s32.totalorder %v7012_v55, %v6612_v8  ;;  %vm7067_vm4 = vmpackc.low %vm686_vm6, %vm681_vm9  ;;  %5848 = vmatprep.subr.msk.bf16.mxu1 %vm5847_vm12, %v6355_v12  ;;  %vm638_vm12 = vcmp.eq.s32.totalorder %v6737_v29, %v6722_v26  ;;  %vm8121_vm9 = vnez %v8112_v54  ;;  %v5200_v54 = vld [vmem:[%s8043_s1 + $0x28] sm:$0xff] }
  0xbe   : > { %5800 = vmatprep.subr.msk.bf16.mxu0 %vm6946_vm15, %v6355_v12  ;;  %vm634_vm15 = vcmp.eq.s32.totalorder %v6734_v28, %v6701_v23  ;;  %vm5849_vm13 = vmpackc.low %vm628_vm14, %vm623_vm8  ;;  %vm702_vm8 = vcmp.eq.s32.totalorder %v7049_v60, %v6612_v8 }
  0xbf   : > { %vm7089_vm6 = vmpackc.low %vm697_vm3, %vm692_vm5  ;;  %5850 = vmatpush1.bf16.msk.msra.mxu1 %vm5849_vm13, %v6355_v12  ;;  %vm664_vm13 = vcmp.eq.s32.totalorder %v6869_v41, %v6701_v23 }
  0xc0   : > { %vm5851_vm5 = vmpackc.low %vm639_vm1, %vm634_vm15  ;;  %vm654_vm15 = vcmp.eq.s32.totalorder %v6821_v37, %v6701_v23  ;;  %vm8129_vm1 = vcmp.eq.s32.totalorder %v7049_v60, %v6616_v9 }
  0xc1   : > { %5802 = vmatpush1.bf16.msk.msra.mxu0 %vm6972_vm2, %v6355_v12  ;;  %vm707_vm2 = vcmp.eq.s32.totalorder %v7062_v61, %v6612_v8  ;;  %5852 = vmatprep.subr.msk.bf16.mxu1 %vm5851_vm5, %v6355_v12  ;;  %vm643_vm5 = vcmp.eq.s32.totalorder %v6775_v33, %v6722_v26 }
  0xc2   : > { %5804 = vmatprep.subr.msk.bf16.mxu0 %vm8121_vm9, %v6355_v12  ;;  %vm7121_vm9 = vmpackc.low %vm696_vm0, %vm691_vm7  ;;  %vm706_vm7 = vcmp.eq.s32.totalorder %v7062_v61, %v6616_v9  ;;  %vm8124_vm0 = vcmp.eq.s32.totalorder %v6734_v28, %v6722_v26 }
  0xc3   : > { %v8123_v24 = vsel %vm7121_vm9, 4294967295, %v8122_v24  ;;  %vm5853_vm14 = vmpackc.low %vm638_vm12, %vm8124_vm0  ;;  %vm648_vm0 = vcmp.eq.s32.totalorder %v6778_v34, %v6722_v26  ;;  %vm663_vm9 = vcmp.eq.s32.totalorder %v6869_v41, %v6722_v26 }
  0xc4   : > { %vm7154_vm12 = vmpackc.low %vm707_vm2, %vm702_vm8  ;;  %5854 = vmatpush1.bf16.msk.msra.mxu1 %vm5853_vm14, %v6355_v12  ;;  %vm8127_vm8 = vcmp.eq.s32.totalorder %v6775_v33, %v6701_v23  ;;  %vm8128_vm14 = vcmp.eq.s32.totalorder %v6778_v34, %v6701_v23 }
  0xc5   : > { %5806 = vmatpush1.bf16.msk.msra.mxu0 %vm7020_vm11, %v6355_v12  ;;  %v8126_v25 = vsel %vm7154_vm12, 4294967295, %v8125_v25  ;;  %vm5855_vm2 = vmpackc.low %vm8128_vm14, %vm8127_vm8  ;;  %vm659_vm11 = vcmp.eq.s32.totalorder %v6824_v38, %v6701_v23  ;;  %vm653_vm8 = vcmp.eq.s32.totalorder %v6821_v37, %v6722_v26  ;;  %vm658_vm14 = vcmp.eq.s32.totalorder %v6824_v38, %v6722_v26 }
  0xc6   : > { %5808 = vmatprep.subr.msk.bf16.mxu0 %vm7039_vm10, %v6355_v12  ;;  %vm7187_vm10 = vmpackc.low %vm706_vm7, %vm8129_vm1  ;;  %5856 = vmatprep.subr.msk.bf16.mxu1 %vm5855_vm2, %v6355_v12  ;;  %vm669_vm1 = vcmp.eq.s32.totalorder %v6872_v42, %v6701_v23  ;;  %vm712_vm7 = vcmp.eq.s32.totalorder %v7109_v5, %v6612_v8  ;;  %vm717_vm2 = vcmp.eq.s32.totalorder %v7160_v27, %v6612_v8  ;;  %v2143_v8 = vld [vmem:[#allocation2] sm:$0xf] }
  0xc7   : > { %v8131_v30 = vsel %vm7187_vm10, 4294967295, %v8130_v30  ;;  %vm5857_vm3 = vmpackc.low %vm648_vm0, %vm643_vm5  ;;  %vm711_vm5 = vcmp.eq.s32.totalorder %v7109_v5, %v6616_v9  ;;  %vm716_vm0 = vcmp.eq.s32.totalorder %v7160_v27, %v6616_v9  ;;  %v8135_v9 = vmov 0 }
  0xc8   : > { %5858 = vmatpush1.bf16.msk.msra.mxu1 %vm5857_vm3, %v6355_v12  ;;  %vm5859_vm10 = vmpackc.low %vm659_vm11, %vm654_vm15  ;;  %vm668_vm3 = vcmp.eq.s32.totalorder %v6872_v42, %v6722_v26  ;;  %vm679_vm11 = vcmp.eq.s32.totalorder %v6918_v47, %v6701_v23 }
  0xc9   : > { %5810 = vmatpush1.bf16.msk.msra.mxu0 %vm7067_vm4, %v6355_v12  ;;  %5860 = vmatprep.subr.msk.bf16.mxu1 %vm5859_vm10, %v6355_v12  ;;  %vm5861_vm4 = vmpackc.low %vm658_vm14, %vm653_vm8  ;;  %vm8134_vm10 = vnez %v8123_v24  ;;  %vm673_vm8 = vcmp.eq.s32.totalorder %v6915_v46, %v6722_v26  ;;  %vm678_vm14 = vcmp.eq.s32.totalorder %v6918_v47, %v6722_v26 }
  0xca   : > { %5812 = vmatprep.subr.msk.bf16.mxu0 %vm7089_vm6, %v6355_v12  ;;  %vm5863_vm12 = vmpackc.low %vm669_vm1, %vm664_vm13  ;;  %vm674_vm6 = vcmp.eq.s32.totalorder %v6915_v46, %v6701_v23  ;;  %vm8137_vm1 = vnez %v8126_v25 }
  0xcb   : > { %vm7223_vm15 = vmpackc.low %vm717_vm2, %vm712_vm7  ;;  %vm684_vm2 = vcmp.eq.s32.totalorder %v6963_v51, %v6701_v23 }
  0xcc   : > { %vm7234_vm13 = vmpackc.low %vm716_vm0, %vm711_vm5  ;;  %5862 = vmatpush1.bf16.msk.msra.mxu1 %vm5861_vm4, %v6355_v12  ;;  %vm689_vm5 = vcmp.eq.s32.totalorder %v6966_v52, %v6701_v23  ;;  %vm683_vm4 = vcmp.eq.s32.totalorder %v6963_v51, %v6722_v26 }
  0xcd   : > { %5814 = vmatpush1.bf16.msk.msra.mxu0 %vm8134_vm10, %v6355_v12  ;;  %v8136_v9 = vsel %vm7234_vm13, 4294967295, %v8135_v9  ;;  %5864 = vmatprep.subr.msk.bf16.mxu1 %vm5863_vm12, %v6355_v12  ;;  %vm5865_vm7 = vmpackc.low %vm668_vm3, %vm663_vm9  ;;  %vm688_vm10 = vcmp.eq.s32.totalorder %v6966_v52, %v6722_v26  ;;  %vm694_vm9 = vcmp.eq.s32.totalorder %v7012_v55, %v6701_v23  ;;  %vm699_vm12 = vcmp.eq.s32.totalorder %v7015_v56, %v6701_v23 }
  0xce   : > { %5816 = vmatprep.subr.msk.bf16.mxu0 %vm8137_vm1, %v6355_v12  ;;  %vm5867_vm0 = vmpackc.low %vm679_vm11, %vm674_vm6  ;;  %vm8140_vm3 = vnez %v8131_v30  ;;  %vm693_vm11 = vcmp.eq.s32.totalorder %v7012_v55, %v6722_v26  ;;  %vm704_vm1 = vcmp.eq.s32.totalorder %v7049_v60, %v6701_v23  ;;  %v6360_v30 = vmov 0.0|0.0  }
  0xcf   : > { %vm7255_vm13 = vmpackc.low %vm678_vm14, %vm673_vm8  ;;  %vm698_vm8 = vcmp.eq.s32.totalorder %v7015_v56, %v6722_v26 }
  0xd0   : > { %5866 = vmatpush1.bf16.msk.msra.mxu1 %vm5865_vm7, %v6355_v12  ;;  %vm7267_vm6 = vmpackc.low %vm689_vm5, %vm684_vm2  ;;  %vm709_vm7 = vcmp.eq.s32.totalorder %v7062_v61, %v6701_v23  ;;  %vm703_vm5 = vcmp.eq.s32.totalorder %v7049_v60, %v6722_v26 }
  0xd1   : > { %5818 = vmatpush1.bf16.msk.msra.mxu0 %vm8140_vm3, %v6355_v12  ;;  %5868 = vmatprep.subr.msk.bf16.mxu1 %vm5867_vm0, %v6355_v12  ;;  %vm7279_vm14 = vmpackc.low %vm688_vm10, %vm683_vm4  ;;  %vm645_vm4 = vcmp.eq.s32.totalorder %v6775_v33, %v7084_v63  ;;  %vm650_vm10 = vcmp.eq.s32.totalorder %v6778_v34, %v7084_v63  ;;  %vm565_vm3 = vcmp.eq.s32.totalorder %v6588_v1, %v7084_v63  ;;  %v8152_v33 = vmov 0  ;;  %v2220_v34 = vld [vmem:[#allocation2 + $0x4] sm:$0xf] }
  0xd2   : > { %5820 = vmatprep.subr.msk.bf16.mxu0 %vm7223_vm15, %v6355_v12  ;;  %vm7287_vm2 = vmpackc.low %vm699_vm12, %vm694_vm9  ;;  %vm708_vm15 = vcmp.eq.s32.totalorder %v7062_v61, %v6722_v26  ;;  %vm8149_vm9 = vnez %v8136_v9 }
  0xd3   : > { %vm7295_vm0 = vmpackc.low %vm698_vm8, %vm693_vm11  ;;  %vm570_vm11 = vcmp.eq.s32.totalorder %v6597_v4, %v7084_v63 }
  0xd4   : > { %5870 = vmatpush1.bf16.msk.msra.mxu1 %vm7255_vm13, %v6355_v12  ;;  %vm7309_vm12 = vmpackc.low %vm709_vm7, %vm704_vm1  ;;  %vm655_vm13 = vcmp.eq.s32.totalorder %v6821_v37, %v7084_v63  ;;  %vm660_vm1 = vcmp.eq.s32.totalorder %v6824_v38, %v7084_v63 }
  0xd5   : > { %5822 = vmatpush1.bf16.msk.msra.mxu0 %vm8149_vm9, %v6355_v12  ;;  %v8151_v40 = vsel %vm7309_vm12, 4294967295, %v8150_v40  ;;  %5872 = vmatprep.subr.msk.bf16.mxu1 %vm7267_vm6, %v6355_v12  ;;  %vm7320_vm8 = vmpackc.low %vm708_vm15, %vm703_vm5  ;;  %vm575_vm9 = vcmp.eq.s32.totalorder %v6605_v6, %v7084_v63  ;;  %vm580_vm12 = vcmp.eq.s32.totalorder %v6608_v7, %v7084_v63  ;;  %vm665_vm5 = vcmp.eq.s32.totalorder %v6869_v41, %v7084_v63 }
  0xd6   : > { %v8153_v33 = vsel %vm7320_vm8, 4294967295, %v8152_v33  ;;  %vm5887_vm7 = vmpackc.low %vm650_vm10, %vm645_vm4  ;;  %vm670_vm15 = vcmp.eq.s32.totalorder %v6872_v42, %v7084_v63  ;;  %vm714_vm4 = vcmp.eq.s32.totalorder %v7109_v5, %v6701_v23  ;;  %vm719_vm10 = vcmp.eq.s32.totalorder %v7160_v27, %v6701_v23  ;;  %v1096_v42 = vld [vmem:[%s8044_s2] sm:$0xff] }
  0xd7   : > { %5888 = vmatprep.subr.msk.bf16.mxu0 %vm5887_vm7, %v6355_v12  ;;  %vm5889_vm6 = vmpackc.low %vm570_vm11, %vm565_vm3  ;;  %vm713_vm3 = vcmp.eq.s32.totalorder %v7109_v5, %v6722_v26  ;;  %vm718_vm11 = vcmp.eq.s32.totalorder %v7160_v27, %v6722_v26  ;;  %vm680_vm8 = vcmp.eq.s32.totalorder %v6918_v47, %v7084_v63  ;;  %v5188_v47 = vld [vmem:[%s8043_s1 + $0x8] sm:$0xff] }
  0xd8   : > { %949 = vmatmul.mubr.f32.vlgmr.msra.gmra.mrb[0].mxu0 %v6893_v44  ;;  %5874 = vmatpush1.bf16.msk.msra.mxu1 %vm7279_vm14, %v6355_v12  ;;  %vm5891_vm7 = vmpackc.low %vm660_vm1, %vm655_vm13  ;;  %vm585_vm1 = vcmp.eq.s32.totalorder %v6619_v10, %v7084_v63 }
  0xd9   : > { %5890 = vmatpush3.bf16.msk.msra.mxu0 %vm5889_vm6, %v6355_v12  ;;  %5876 = vmatprep.subr.msk.bf16.mxu1 %vm7287_vm2, %v6355_v12  ;;  %vm5893_vm14 = vmpackc.low %vm580_vm12, %vm575_vm9  ;;  %vm590_vm2 = vcmp.eq.s32.totalorder %v6622_v11, %v7084_v63  ;;  %vm8158_vm9 = vnez %v8151_v40 }
  0xda   : > { %5892 = vmatprep.subr.msk.bf16.mxu0 %vm5891_vm7, %v6355_v12  ;;  %vm5895_vm13 = vmpackc.low %vm670_vm15, %vm665_vm5  ;;  %1090 = vmatprep.mubr.f32.mxu0 %v6934_v49  ;;  %vm675_vm7 = vcmp.eq.s32.totalorder %v6915_v46, %v7084_v63  ;;  %vm595_vm15 = vcmp.eq.s32.totalorder %v6646_v13, %v7084_v63  ;;  %v7504_v46 = vrot.slane %v7496_v43, %v6594_v3  ;;  %v5191_v49 = vld [vmem:[%s8043_s1 + $0x10] sm:$0xff] }
  0xdb   : > { %vm7365_vm6 = vmpackc.low %vm719_vm10, %vm714_vm4  ;;  %vm600_vm4 = vcmp.eq.s32.totalorder %v6649_v14, %v7084_v63  ;;  %vm685_vm10 = vcmp.eq.s32.totalorder %v6963_v51, %v7084_v63  ;;  %v5194_v51 = vld [vmem:[%s8043_s1 + $0x18] sm:$0xff] }
  0xdc   : > { %5878 = vmatpush1.bf16.msk.msra.mxu1 %vm7295_vm0, %v6355_v12  ;;  %vm7376_vm12 = vmpackc.low %vm718_vm11, %vm713_vm3  ;;  %vm690_vm3 = vcmp.eq.s32.totalorder %v6966_v52, %v7084_v63  ;;  %vm8159_vm11 = vcmp.eq.s32.totalorder %v6654_v15, %v7084_v63  ;;  %v5197_v52 = vld [vmem:[%s8043_s1 + $0x20] sm:$0xff] }
  0xdd   : > { %5894 = vmatpush3.bf16.msk.msra.mxu0 %vm5893_vm14, %v6355_v12  ;;  %5880 = vmatprep.subr.msk.bf16.mxu1 %vm8158_vm9, %v6355_v12  ;;  %vm5897_vm5 = vmpackc.low %vm590_vm2, %vm585_vm1  ;;  %vm8160_vm14 = vcmp.eq.s32.totalorder %v6657_v16, %v7084_v63  ;;  %vm8163_vm1 = vnez %v8153_v33  ;;  %vm8164_vm2 = vcmp.eq.s32.totalorder %v6671_v18, %v7084_v63  ;;  %v6356_v18 = vmov 0.0   ;;  %v7678_v33 = vld [vmem:[%s8051_s9] sm:$0x1f]  ;;  %v2300_v16 = vld [vmem:[#allocation2 + $0x8] sm:$0xf] }
  0xde   : > { %5896 = vmatprep.subr.msk.bf16.mxu0 %vm5895_vm13, %v6355_v12  ;;  %vm5899_vm0 = vmpackc.low %vm680_vm8, %vm675_vm7  ;;  %vm8165_vm7 = vcmp.eq.s32.totalorder %v6674_v19, %v7084_v63  ;;  %v1102_v19 = vld [vmem:[%s8043_s1] sm:$0xff]  ;;  %v7682_v23 = vrot.slane %v7678_v33, %v6591_v2  ;;  %v7686_v26 = vrot.slane %v7678_v33, %v6594_v3 }
  0xdf   : > { %vm7399_vm13 = vmpackc.low %vm8160_vm14, %vm8159_vm11 }
  0xe0   : > { %5882 = vmatpush1.bf16.msk.msra.mxu1 %vm8163_vm1, %v6355_v12  ;;  %vm5901_vm8 = vmpackc.low %vm600_vm4, %vm595_vm15  ;;  %vm700_vm15 = vcmp.eq.s32.totalorder %v7015_v56, %v7084_v63  ;;  %vm8169_vm4 = vcmp.eq.s32.totalorder %v6693_v22, %v7084_v63 }
  0xe1   : > { %5898 = vmatpush3.bf16.msk.msra.mxu0 %vm5897_vm5, %v6355_v12  ;;  %5884 = vmatprep.subr.msk.bf16.mxu1 %vm7365_vm6, %v6355_v12  ;;  %vm7417_vm9 = vmpackc.low %vm8165_vm7, %vm8164_vm2  ;;  %vm695_vm5 = vcmp.eq.s32.totalorder %v7012_v55, %v7084_v63  ;;  %vm8168_vm6 = vcmp.eq.s32.totalorder %v6690_v21, %v7084_v63  ;;  %vm705_vm2 = vcmp.eq.s32.totalorder %v7049_v60, %v7084_v63  ;;  %v5203_v55 = vld [vmem:[%s8043_s1 + $0x30] sm:$0xff] }
  0xe2   : > { %5900 = vmatprep.subr.msk.bf16.mxu0 %vm5899_vm0, %v6355_v12  ;;  %vm5903_vm11 = vmpackc.low %vm690_vm3, %vm685_vm10  ;;  %vm8172_vm10 = vcmp.eq.s32.totalorder %v6734_v28, %v7084_v63  ;;  %vm8173_vm3 = vcmp.eq.s32.totalorder %v6737_v29, %v7084_v63  ;;  %vm715_vm7 = vcmp.eq.s32.totalorder %v7109_v5, %v7084_v63  ;;  %v1836_v60 = vrot.slane %v7496_v43, %v6664_v17 }
  0xe3   : > { %vm7431_vm0 = vmpackc.low %vm8169_vm4, %vm8168_vm6  ;;  %vm1842_vm6 = vcmp.eq.s32.totalorder %v6588_v1, %v7500_v45  ;;  %vm1847_vm4 = vcmp.eq.s32.totalorder %v6597_v4, %v7500_v45 }
  0xe4   : > { %5886 = vmatpush1.bf16.msk.msra.mxu1 %vm7376_vm12, %v6355_v12  ;;  %vm5917_vm14 = vmpackc.low %vm8173_vm3, %vm8172_vm10  ;;  %vm710_vm12 = vcmp.eq.s32.totalorder %v7062_v61, %v7084_v63  ;;  %vm1846_vm10 = vcmp.eq.s32.totalorder %v6597_v4, %v7504_v46 }
  0xe5   : > { %5902 = vmatpush3.bf16.msk.msra.mxu0 %vm5901_vm8, %v6355_v12  ;;  %vm5907_vm1 = vmpackc.low %vm700_vm15, %vm695_vm5  ;;  %5522 = vmatprep.subr.mxu1 %v6356_v18  ;;  %vm8061_vm15 = vcmask 31744  }
  0xe6   : > { %5904 = vmatprep.subr.msk.bf16.mxu0 %vm5903_vm11, %v6355_v12  ;;  %vm5911_vm8 = vmpackc.low %vm710_vm12, %vm705_vm2  ;;  %vm720_vm11 = vcmp.eq.s32.totalorder %v7160_v27, %v7084_v63  ;;  %vm1851_vm2 = vcmp.eq.s32.totalorder %v6605_v6, %v7504_v46  ;;  %vm1856_vm12 = vcmp.eq.s32.totalorder %v6608_v7, %v7504_v46  ;;  %v1840_v27 = vrot.slane %v7496_v43, %v7034_v58  ;;  %v2768_v43 = vld [vmem:[#allocation2 + $0x20] sm:$0xf] }
  0xe7   : > { %1020 = vmatmul.mubr.f32.vlgmr.msra.gmra.mrb[0].mxu1 %v6893_v44  ;;  %vm5915_vm5 = vmpackc.low %vm720_vm11, %vm715_vm7  ;;  %vm1862_vm7 = vcmp.eq.s32.totalorder %v6619_v10, %v7500_v45  ;;  %vm1867_vm11 = vcmp.eq.s32.totalorder %v6622_v11, %v7500_v45 }
  0xe8   : > { %vm5919_vm3 = vmpackc.low %vm1847_vm4, %vm1842_vm6 }
  0xe9   : > { %5906 = vmatpush3.bf16.msk.msra.mxu0 %vm7399_vm13, %v6355_v12  ;;  %vm8059_vm13 = vmmov 0   ;;  %vm5925_vm6 = vmpackc.low %vm1856_vm12, %vm1851_vm2  ;;  %vm1871_vm2 = vcmp.eq.s32.totalorder %v6646_v13, %v7504_v46  ;;  %vm1876_vm12 = vcmp.eq.s32.totalorder %v6649_v14, %v7504_v46 }
  0xea   : > { %5908 = vmatprep.subr.msk.bf16.mxu0 %vm5907_vm1, %v6355_v12  ;;  %5524 = vmatprep.mubr.msk.f32.mxu1 %vm8059_vm13, %v6356_v18  ;;  %vm1857_vm1 = vcmp.eq.s32.totalorder %v6608_v7, %v7500_v45  ;;  %vm5927_vm4 = vmpackc.low %vm1867_vm11, %vm1862_vm7  ;;  %vm1844_vm7 = vcmp.eq.s32.totalorder %v6588_v1, %v1836_v60  ;;  %vm1849_vm11 = vcmp.eq.s32.totalorder %v6597_v4, %v1836_v60 }
  0xed   : > { %5910 = vmatpush3.bf16.msk.msra.mxu0 %vm7417_vm9, %v6355_v12  ;;  %vm8062_vm9 = vcmask 1043456  }
  0xee   : > { %5912 = vmatprep.subr.msk.bf16.mxu0 %vm5911_vm8, %v6355_v12 }
  0xf1   : > { %5914 = vmatpush3.bf16.msk.msra.mxu0 %vm7431_vm0, %v6355_v12  ;;  %vm1841_vm0 = vcmp.eq.s32.totalorder %v6588_v1, %v7504_v46 }
  0xf2   : > { %5916 = vmatprep.subr.msk.bf16.mxu0 %vm5915_vm5, %v6355_v12  ;;  %vm5921_vm8 = vmpackc.low %vm1846_vm10, %vm1841_vm0  ;;  %vm8174_vm10 = vmmov 0  }
  0xf5   : > { %5918 = vmatpush3.bf16.msk.msra.mxu0 %vm5917_vm14, %v6355_v12  ;;  %vm1852_vm14 = vcmp.eq.s32.totalorder %v6605_v6, %v7500_v45 }
  0xf6   : > { %5920 = vmatprep.subr.msk.bf16.mxu0 %vm5919_vm3, %v6355_v12  ;;  %vm5923_vm5 = vmpackc.low %vm1857_vm1, %vm1852_vm14  ;;  %vm1866_vm3 = vcmp.eq.s32.totalorder %v6622_v11, %v7504_v46  ;;  %vm1877_vm14 = vcmp.eq.s32.totalorder %v6649_v14, %v7500_v45 }
  0xf8   : > { %1091 = vmatmul.mubr.f32.vlgmr.msra.gmra.mrb[2].mxu0 %v6893_v44  ;;  %v6359_v44 = vmov 0  }
  0xf9   : > { %1989 = vmatprep.mubr.f32.mxu0 %v6356_v18  ;;  %6185 = vset.pattern.permute.xlu0 %v6359_v44 }
  0xfa   : > { %6186 = vset.pattern.permute.xlu1 %v6359_v44  ;;  %5922 = vmatpush1.bf16.msk.msra.mxu0 %vm5921_vm8, %v6355_v12  ;;  %vm5933_vm8 = vmpackc.low %vm1876_vm12, %vm1871_vm2  ;;  %vm1853_vm2 = vcmp.eq.s32.totalorder %v6605_v6, %v1832_v62  ;;  %vm1858_vm12 = vcmp.eq.s32.totalorder %v6608_v7, %v1832_v62  ;;  %v2861_v44 = vrot.slane %v7678_v33, %v6664_v17 }
  0xfb   : > { %5924 = vmatprep.subr.msk.bf16.mxu0 %vm5923_vm5, %v6355_v12  ;;  %vm5935_vm5 = vmpackc.low %vm1849_vm11, %vm1844_vm7  ;;  %vm1869_vm7 = vcmp.eq.s32.totalorder %v6622_v11, %v1836_v60 }
  0xfc   : > { %vm5941_vm11 = vmpackc.low %vm1858_vm12, %vm1853_vm2  ;;  %vm1845_vm12 = vcmp.eq.s32.totalorder %v6588_v1, %v1840_v27 }
  0xfe   : > { %5926 = vmatpush1.bf16.msk.msra.mxu0 %vm5925_vm6, %v6355_v12  ;;  %vm1843_vm6 = vcmp.eq.s32.totalorder %v6588_v1, %v1832_v62 }
  0xff   : > { %5928 = vmatprep.subr.msk.bf16.mxu0 %vm5927_vm4, %v6355_v12  ;;  %vm1848_vm4 = vcmp.eq.s32.totalorder %v6597_v4, %v1832_v62 }
 0x1ab   : > { %v950_v21 = vpop.f32.mrb[0].mxu0 }
 0x1ac   : > { %1184 = vrot.lane.b32.xlu0 %v950_v21, %s6358_s22  ;;  %v952_v22 = vpop.f32.mrb[1].mxu0  ;;  %5523 = vmatpush3.msk.msra.mxu1 %vm8062_vm9, %v950_v21  ;;  %v2376_v21 = vld [vmem:[#allocation2 + $0xc] sm:$0xf] }
 0x1ad   : > { %5525 = vmatmul.mubr.msk.f32.vlgmr.msra.gmra.mrb[2].mxu1 %vm8061_vm15, %v1102_v19  ;;  %5527 = vmatprep.subr.mxu1 %v6356_v18 }
 0x1ae   : > { %5529 = vmatprep.mubr.msk.f32.mxu1 %vm8059_vm13, %v6356_v18  ;;  %vm1861_vm13 = vcmp.eq.s32.totalorder %v6619_v10, %v7504_v46 }
 0x1af   : > { %vm5929_vm0 = vmpackc.low %vm1866_vm3, %vm1861_vm13  ;;  %vm1872_vm13 = vcmp.eq.s32.totalorder %v6646_v13, %v7500_v45  ;;  %vm1854_vm3 = vcmp.eq.s32.totalorder %v6605_v6, %v1836_v60  ;;  %v2857_v45 = vrot.slane %v7678_v33, %v6682_v20 }
 0x1b0   : > { %1343 = vrot.lane.b32.xlu0 %v952_v22, %s6358_s22  ;;  %5930 = vmatpush1.bf16.msk.msra.mxu0 %vm5929_vm0, %v6355_v12  ;;  %vm5931_vm1 = vmpackc.low %vm1877_vm14, %vm1872_vm13  ;;  %vm1859_vm0 = vcmp.eq.s32.totalorder %v6608_v7, %v1836_v60  ;;  %vm1921_vm13 = vcmask 523264  }
 0x1b1   : > { %5932 = vmatprep.subr.msk.bf16.mxu0 %vm5931_vm1, %v6355_v12  ;;  %vm5937_vm14 = vmpackc.low %vm1848_vm4, %vm1843_vm6  ;;  %vm1863_vm6 = vcmp.eq.s32.totalorder %v6619_v10, %v1832_v62  ;;  %vm1868_vm4 = vcmp.eq.s32.totalorder %v6622_v11, %v1832_v62 }
 0x1b2   : > { %vm5939_vm1 = vmpackc.low %vm1859_vm0, %vm1854_vm3  ;;  %vm1874_vm3 = vcmp.eq.s32.totalorder %v6646_v13, %v1836_v60  ;;  %vm1879_vm0 = vcmp.eq.s32.totalorder %v6649_v14, %v1836_v60 }
 0x1b4   : > { %1099 = vperm.xlu0 %6185, %v1096_v42   ;;  %5934 = vmatpush1.bf16.msk.msra.mxu0 %vm5933_vm8, %v6355_v12  ;;  %vm1864_vm8 = vcmp.eq.s32.totalorder %v6619_v10, %v1836_v60  ;;  %v2865_v42 = vrot.slane %v7678_v33, %v7034_v58  ;;  %v3161_v60 = vld [vmem:[#allocation6] sm:$0xff] }
 0x1b5   : > { %5936 = vmatprep.subr.msk.bf16.mxu0 %vm5935_vm5, %v6355_v12  ;;  %vm5943_vm5 = vmpackc.low %vm1869_vm7, %vm1864_vm8  ;;  %vm1850_vm8 = vcmp.eq.s32.totalorder %v6597_v4, %v1840_v27 }
 0x1b6   : > { %vm5952_vm7 = vmpackc.low %vm1850_vm8, %vm1845_vm12  ;;  %vm2872_vm12 = vcmp.eq.s32.totalorder %v6597_v4, %v7682_v23  ;;  %vm2866_vm8 = vcmp.eq.s32.totalorder %v6588_v1, %v7686_v26 }
 0x1ba   : > { %v1021_v28 = vpop.f32.mrb[0].mxu1 }
 0x1bb   : > { %1502 = vrot.lane.b32.xlu1 %v1021_v28, %s6358_s22  ;;  %v7484_v29 = vpop.f32.mrb[1].mxu1 }
 0x1bf   : > { %1661 = vrot.lane.b32.xlu1 %v7484_v29, %s6358_s22 }
 0x1cb   : > { %v5420_v37 = vpop.f32.mrb[2].mxu0 }
 0x1cc   : > { %v5421_v38 = vpop.f32.mrb[3].mxu0 }
 0x1cd   : > { %v7488_v41 = vadd.f32 %v5421_v38, %v5420_v37  ;;  %v2612_v37 = vld [vmem:[#allocation2 + $0x18] sm:$0xf] }
 0x21e   : > { %v1185_v48 = vpop.permute.xlu0 %1184 }
 0x21f   : > { %5528 = vmatpush3.msk.msra.mxu1 %vm8062_vm9, %v1185_v48 }
 0x220   : > { %5530 = vmatmul.mubr.msk.f32.vlgmr.msra.gmra.mrb[2].mxu1 %vm8061_vm15, %v5188_v47  ;;  %5532 = vmatprep.subr.mxu1 %v6356_v18 }
 0x221   : > { %5533 = vmatpush3.msk.msra.mxu1 %vm8062_vm9, %v952_v22  ;;  %5534 = vmatprep.mubr.msk.f32.mxu1 %vm8174_vm10, %v6356_v18  ;;  %v2456_v22 = vld [vmem:[#allocation2 + $0x10] sm:$0xf] }
 0x222   : > { %5537 = vmatprep.subr.mxu1 %v6356_v18  ;;  %v1344_v50 = vpop.permute.xlu0 %1343 }
 0x228   : > { %5535 = vmatmul.mubr.msk.f32.vlgmr.msra.gmra.mrb[2].mxu1 %vm8061_vm15, %v5191_v49 }
 0x229   : > { %5538 = vmatpush3.msk.msra.mxu1 %vm8062_vm9, %v1344_v50  ;;  %5539 = vmatprep.mubr.msk.f32.mxu1 %vm8174_vm10, %v6356_v18 }
 0x22a   : > { %5542 = vmatprep.subr.mxu1 %v6356_v18 }
 0x22d   : > { %v1503_v53 = vpop.permute.xlu1 %1502 }
 0x230   : > { %5540 = vmatmul.mubr.msk.f32.vlgmr.msra.gmra.mrb[2].mxu1 %vm8061_vm15, %v5194_v51 }
 0x231   : > { %5543 = vmatpush3.msk.msra.mxu1 %vm8062_vm9, %v1021_v28  ;;  %5544 = vmatprep.mubr.msk.f32.mxu1 %vm8174_vm10, %v6356_v18  ;;  %v1662_v56 = vpop.permute.xlu1 %1661 }
 0x232   : > { %5547 = vmatprep.subr.mxu1 %v6356_v18 }
 0x233   : > { %v1100_v61 = vpop.permute.xlu0 %1099 }
 0x238   : > { %5545 = vmatmul.mubr.msk.f32.vlgmr.msra.gmra.mrb[2].mxu1 %vm8061_vm15, %v5197_v52 }
 0x239   : > { %5548 = vmatpush3.msk.msra.mxu1 %vm8062_vm9, %v1503_v53  ;;  %5549 = vmatprep.mubr.msk.f32.mxu1 %vm8174_vm10, %v6356_v18 }
 0x23a   : > { %5552 = vmatprep.subr.mxu1 %v6356_v18 }
 0x240   : > { %5550 = vmatmul.mubr.msk.f32.vlgmr.msra.gmra.mrb[2].mxu1 %vm8061_vm15, %v5200_v54 }
 0x241   : > { %5553 = vmatpush3.msk.msra.mxu1 %vm8062_vm9, %v7484_v29  ;;  %5554 = vmatprep.mubr.msk.f32.mxu1 %vm8174_vm10, %v6356_v18  ;;  %v2532_v29 = vld [vmem:[#allocation2 + $0x14] sm:$0xf] }
 0x242   : > { %5557 = vmatprep.subr.mxu1 %v6356_v18 }
 0x248   : > { %5555 = vmatmul.mubr.msk.f32.vlgmr.msra.gmra.mrb[2].mxu1 %vm8061_vm15, %v5203_v55 }
 0x249   : > { %5558 = vmatpush3.msk.msra.mxu1 %vm8062_vm9, %v1662_v56  ;;  %5559 = vmatprep.mubr.msk.f32.mxu1 %vm8174_vm10, %v6356_v18 }
 0x24a   : > { %5562 = vmatprep.subr.mxu1 %v6356_v18 }
 0x250   : > { %5560 = vmatmul.mubr.msk.f32.vlgmr.msra.gmra.mrb[2].mxu1 %vm8061_vm15, %v5206_v57 }
 0x251   : > { %5563 = vmatpush3.msk.msra.mxu1 %vm8062_vm9, %v7488_v41  ;;  %5564 = vmatprep.mubr.msk.f32.mxu1 %vm8174_vm10, %v6356_v18  ;;  %vm1873_vm9 = vcmp.eq.s32.totalorder %v6646_v13, %v1832_v62  ;;  %v2688_v41 = vld [vmem:[#allocation2 + $0x1c] sm:$0xf] }
 0x252   : > { %5586 = vmatprep.subr.mxu1 %v6356_v18 }
 0x258   : > { %5565 = vmatmul.mubr.msk.f32.vlgmr.msra.gmra.mrb[2].mxu1 %vm8061_vm15, %v5209_v59  ;;  %vm5945_vm15 = vmpackc.low %vm1868_vm4, %vm1863_vm6  ;;  %vm1870_vm6 = vcmp.eq.s32.totalorder %v6622_v11, %v1840_v27  ;;  %v3167_v59 = vld [vmem:[%s8049_s7] sm:$0xff] }
 0x259   : > { %5588 = vmatprep.mubr.msk.f32.mxu1 %vm8174_vm10, %v6356_v18 }
 0x32b   : > { %v1813_v63 = vpop.f32.mrb[2].mxu1 }
 0x32c   : > { %v6051_v0 = vadd.f32 %v1813_v63, %v1100_v61  ;;  %v5566_v5 = vpop.f32.mrb[3].mxu1  ;;  %v7831_v61 = vld [vmem:[%s8054_s12] sm:$0x1f] }
 0x32d   : > { %v7839_v63 = vrot.slane %v7831_v61, %v6594_v3  ;;  %v3894_v33 = vrot.slane %v7831_v61, %v6682_v20 }
 0x32e   : > { %v1818_v24 = vmax.f32 %v6051_v0, 0.0  ;;  %v5312_v0 = vld [vmem:[%s8049_s7 + $0x10] sm:$0xff] }
 0x330   : > { %v1819_v25 = vmin.f32 %v1818_v24, 6.0  ;;  %v5315_v24 = vld [vmem:[%s8049_s7 + $0x18] sm:$0xff] }
 0x332   : > { %5228 = vmatmul.mubr.msk.f32.vlgmr.msra.gmra.mrb[4].mxu0 %vm1921_vm13, %v1819_v25 }
 0x333   : > { %5938 = vmatpush1.bf16.msk.msra.mxu0 %vm5937_vm14, %v6355_v12  ;;  %2060 = vmatprep.mubr.f32.mxu0 %v6356_v18  ;;  %vm5947_vm14 = vmpackc.low %vm1879_vm0, %vm1874_vm3  ;;  %vm1875_vm3 = vcmp.eq.s32.totalorder %v6646_v13, %v1840_v27  ;;  %vm1880_vm0 = vcmp.eq.s32.totalorder %v6649_v14, %v1840_v27 }
 0x334   : > { %5940 = vmatprep.subr.msk.bf16.mxu0 %vm5939_vm1, %v6355_v12  ;;  %vm1878_vm1 = vcmp.eq.s32.totalorder %v6649_v14, %v1832_v62  ;;  %v7835_v62 = vrot.slane %v7831_v61, %v6591_v2  ;;  %v5309_v2 = vld [vmem:[%s8049_s7 + $0x8] sm:$0xff] }
 0x335   : > { %vm5949_vm2 = vmpackc.low %vm1878_vm1, %vm1873_vm9  ;;  %vm8063_vm1 = vcmask 64512  }
 0x337   : > { %5942 = vmatpush1.bf16.msk.msra.mxu0 %vm5941_vm11, %v6355_v12  ;;  %vm1855_vm11 = vcmp.eq.s32.totalorder %v6605_v6, %v1840_v27 }
 0x338   : > { %5944 = vmatprep.subr.msk.bf16.mxu0 %vm5943_vm5, %v6355_v12  ;;  %vm1860_vm5 = vcmp.eq.s32.totalorder %v6608_v7, %v1840_v27 }
 0x339   : > { %vm5955_vm9 = vmpackc.low %vm1860_vm5, %vm1855_vm11  ;;  %vm2877_vm5 = vcmp.eq.s32.totalorder %v6605_v6, %v7682_v23 }
 0x33b   : > { %5946 = vmatpush1.bf16.msk.msra.mxu0 %vm5945_vm15, %v6355_v12  ;;  %vm1865_vm15 = vcmp.eq.s32.totalorder %v6619_v10, %v1840_v27 }
 0x33c   : > { %5948 = vmatprep.subr.msk.bf16.mxu0 %vm5947_vm14, %v6355_v12  ;;  %vm5958_vm4 = vmpackc.low %vm1870_vm6, %vm1865_vm15  ;;  %vm2876_vm6 = vcmp.eq.s32.totalorder %v6605_v6, %v7686_v26 }
 0x33d   : > { %vm5961_vm14 = vmpackc.low %vm1880_vm0, %vm1875_vm3  ;;  %vm2887_vm0 = vcmp.eq.s32.totalorder %v6619_v10, %v7682_v23 }
 0x33f   : > { %5950 = vmatpush1.bf16.msk.msra.mxu0 %vm5949_vm2, %v6355_v12  ;;  %vm2867_vm2 = vcmp.eq.s32.totalorder %v6588_v1, %v7682_v23 }
 0x340   : > { %5951 = vmatprep.subr.bf16.mxu0 %v6360_v30  ;;  %vm5963_vm11 = vmpackc.low %vm2872_vm12, %vm2867_vm2  ;;  %vm2886_vm12 = vcmp.eq.s32.totalorder %v6619_v10, %v7686_v26 }
 0x342   : > { %5245 = vmatmul.mubr.msk.f32.vlgmr.msra.gmra.mrb[6].mxu0 %vm1921_vm13, %v1819_v25 }
 0x343   : > { %5953 = vmatpush3.bf16.msk.msra.mxu0 %vm5952_vm7, %v6355_v12  ;;  %5583 = vmatprep.mubr.msk.f32.mxu0 %vm8174_vm10, %v6356_v18  ;;  %vm2871_vm7 = vcmp.eq.s32.totalorder %v6597_v4, %v7686_v26 }
 0x344   : > { %5954 = vmatprep.subr.bf16.mxu0 %v6360_v30  ;;  %vm5965_vm15 = vmpackc.low %vm2871_vm7, %vm2866_vm8  ;;  %vm2891_vm8 = vcmp.eq.s32.totalorder %v6622_v11, %v7686_v26 }
 0x347   : > { %5956 = vmatpush3.bf16.msk.msra.mxu0 %vm5955_vm9, %v6355_v12  ;;  %vm2882_vm9 = vcmp.eq.s32.totalorder %v6608_v7, %v7682_v23 }
 0x348   : > { %5957 = vmatprep.subr.bf16.mxu0 %v6360_v30  ;;  %vm5967_vm3 = vmpackc.low %vm2882_vm9, %vm2877_vm5  ;;  %vm2870_vm5 = vcmp.eq.s32.totalorder %v6588_v1, %v2865_v42  ;;  %vm2875_vm9 = vcmp.eq.s32.totalorder %v6597_v4, %v2865_v42 }
 0x34b   : > { %5959 = vmatpush3.bf16.msk.msra.mxu0 %vm5958_vm4, %v6355_v12  ;;  %vm2881_vm4 = vcmp.eq.s32.totalorder %v6608_v7, %v7686_v26 }
 0x34c   : > { %5960 = vmatprep.subr.bf16.mxu0 %v6360_v30  ;;  %vm5969_vm2 = vmpackc.low %vm2881_vm4, %vm2876_vm6  ;;  %vm2880_vm6 = vcmp.eq.s32.totalorder %v6605_v6, %v2865_v42  ;;  %vm2885_vm4 = vcmp.eq.s32.totalorder %v6608_v7, %v2865_v42 }
 0x34f   : > { %5962 = vmatpush3.bf16.msk.msra.mxu0 %vm5961_vm14, %v6355_v12  ;;  %vm2892_vm14 = vcmp.eq.s32.totalorder %v6622_v11, %v7682_v23 }
 0x350   : > { %5964 = vmatprep.subr.msk.bf16.mxu0 %vm5963_vm11, %v6355_v12  ;;  %vm5971_vm7 = vmpackc.low %vm2892_vm14, %vm2887_vm0  ;;  %vm2890_vm0 = vcmp.eq.s32.totalorder %v6619_v10, %v2865_v42  ;;  %vm2895_vm14 = vcmp.eq.s32.totalorder %v6622_v11, %v2865_v42 }
 0x351   : > { %vm5973_vm11 = vmpackc.low %vm2891_vm8, %vm2886_vm12  ;;  %vm2897_vm12 = vcmp.eq.s32.totalorder %v6646_v13, %v7682_v23  ;;  %vm2902_vm8 = vcmp.eq.s32.totalorder %v6649_v14, %v7682_v23 }
 0x352   : > { %5584 = vmatmul.mubr.msk.f32.vlgmr.msra.gmra.mrb[8].mxu0 %vm1921_vm13, %v1819_v25  ;;  %v5318_v25 = vld [vmem:[%s8049_s7 + $0x20] sm:$0xff] }
 0x353   : > { %3013 = vmatprep.mubr.f32.mxu0 %v6356_v18  ;;  %5966 = vmatpush1.bf16.msk.msra.mxu0 %vm5965_vm15, %v6355_v12  ;;  %vm5996_vm15 = vmpackc.low %vm2875_vm9, %vm2870_vm5  ;;  %vm2901_vm5 = vcmp.eq.s32.totalorder %v6649_v14, %v7686_v26 }
 0x354   : > { %5968 = vmatprep.subr.msk.bf16.mxu0 %vm5967_vm3, %v6355_v12  ;;  %vm5999_vm3 = vmpackc.low %vm2885_vm4, %vm2880_vm6  ;;  %vm2905_vm6 = vcmp.eq.s32.totalorder %v6649_v14, %v2865_v42 }
 0x357   : > { %5970 = vmatpush1.bf16.msk.msra.mxu0 %vm5969_vm2, %v6355_v12  ;;  %vm6002_vm2 = vmpackc.low %vm2895_vm14, %vm2890_vm0  ;;  %vm2874_vm0 = vcmp.eq.s32.totalorder %v6597_v4, %v2861_v44 }
 0x358   : > { %5972 = vmatprep.subr.msk.bf16.mxu0 %vm5971_vm7, %v6355_v12  ;;  %vm5975_vm7 = vmpackc.low %vm2902_vm8, %vm2897_vm12  ;;  %vm2873_vm12 = vcmp.eq.s32.totalorder %v6597_v4, %v2857_v45  ;;  %vm2879_vm8 = vcmp.eq.s32.totalorder %v6605_v6, %v2861_v44 }
 0x35b   : > { %5974 = vmatpush1.bf16.msk.msra.mxu0 %vm5973_vm11, %v6355_v12  ;;  %vm2896_vm11 = vcmp.eq.s32.totalorder %v6646_v13, %v7686_v26 }
 0x35c   : > { %5976 = vmatprep.subr.msk.bf16.mxu0 %vm5975_vm7, %v6355_v12  ;;  %vm5977_vm9 = vmpackc.low %vm2901_vm5, %vm2896_vm11  ;;  %vm2884_vm7 = vcmp.eq.s32.totalorder %v6608_v7, %v2861_v44 }
 0x35d   : > { %vm5983_vm5 = vmpackc.low %vm2884_vm7, %vm2879_vm8  ;;  %vm2904_vm8 = vcmp.eq.s32.totalorder %v6649_v14, %v2861_v44 }
 0x35f   : > { %5978 = vmatpush1.bf16.msk.msra.mxu0 %vm5977_vm9, %v6355_v12  ;;  %vm2878_vm9 = vcmp.eq.s32.totalorder %v6605_v6, %v2857_v45 }
 0x405   : > { %v1991_v9 = vpop.f32.mrb[4].mxu0 }
 0x406   : > { %2222 = vrot.lane.b32.xlu1 %v1991_v9, %s6358_s22  ;;  %v1993_v31 = vpop.f32.mrb[5].mxu0  ;;  %5587 = vmatpush3.msra.mxu1 %v1991_v9  ;;  %v5324_v9 = vld [vmem:[%s8049_s7 + $0x30] sm:$0xff] }
 0x407   : > { %5589 = vmatmul.mubr.msk.f32.vlgmr.msra.gmra.mrb[4].mxu1 %vm8063_vm1, %v2143_v8  ;;  %5591 = vmatprep.subr.mxu1 %v6356_v18  ;;  %v5321_v8 = vld [vmem:[%s8049_s7 + $0x28] sm:$0xff] }
 0x408   : > { %5593 = vmatprep.mubr.msk.f32.mxu1 %vm8174_vm10, %v6356_v18 }
 0x40a   : > { %2378 = vrot.lane.b32.xlu1 %v1993_v31, %s6358_s22 }
 0x415   : > { %v2062_v32 = vpop.f32.mrb[6].mxu0 }
 0x416   : > { %2534 = vrot.lane.b32.xlu0 %v2062_v32, %s6358_s22  ;;  %v2064_v35 = vpop.f32.mrb[7].mxu0 }
 0x417   : > { %2690 = vrot.lane.b32.xlu1 %v2064_v35, %s6358_s22 }
 0x41a   : > { %2140 = vperm.xlu0 %6185, %v2137_v36   ;;  %v5330_v36 = vld [vmem:[%s8049_s7 + $0x40] sm:$0xff] }
 0x425   : > { %v7673_v39 = vpop.f32.mrb[8].mxu0 }
 0x426   : > { %v5585_v40 = vpop.f32.mrb[9].mxu0 }
 0x478   : > { %v2223_v15 = vpop.permute.xlu1 %2222 }
 0x479   : > { %5592 = vmatpush3.msra.mxu1 %v2223_v15 }
 0x47a   : > { %5594 = vmatmul.mubr.msk.f32.vlgmr.msra.gmra.mrb[4].mxu1 %vm8063_vm1, %v2220_v34  ;;  %5596 = vmatprep.subr.mxu1 %v6356_v18 }
 0x47b   : > { %5597 = vmatpush3.msra.mxu1 %v1993_v31  ;;  %5598 = vmatprep.mubr.msk.f32.mxu1 %vm8174_vm10, %v6356_v18 }
 0x47c   : > { %5601 = vmatprep.subr.mxu1 %v6356_v18  ;;  %v2379_v19 = vpop.permute.xlu1 %2378 }
 0x482   : > { %5599 = vmatmul.mubr.msk.f32.vlgmr.msra.gmra.mrb[4].mxu1 %vm8063_vm1, %v2300_v16  ;;  %v4360_v16 = vld [vmem:[#allocation7 + $0x8] sm:$0xf] }
 0x483   : > { %5602 = vmatpush3.msra.mxu1 %v2379_v19  ;;  %5603 = vmatprep.mubr.msk.f32.mxu1 %vm8174_vm10, %v6356_v18 }
 0x484   : > { %5606 = vmatprep.subr.mxu1 %v6356_v18 }
 0x488   : > { %v2535_v28 = vpop.permute.xlu0 %2534 }
 0x489   : > { %v2691_v38 = vpop.permute.xlu1 %2690 }
 0x48a   : > { %5604 = vmatmul.mubr.msk.f32.vlgmr.msra.gmra.mrb[4].mxu1 %vm8063_vm1, %v2376_v21  ;;  %v4436_v21 = vld [vmem:[#allocation7 + $0xc] sm:$0xf] }
 0x48b   : > { %5607 = vmatpush3.msra.mxu1 %v2062_v32  ;;  %5608 = vmatprep.mubr.msk.f32.mxu1 %vm8174_vm10, %v6356_v18  ;;  %v5327_v32 = vld [vmem:[%s8049_s7 + $0x38] sm:$0xff] }
 0x48c   : > { %5611 = vmatprep.subr.mxu1 %v6356_v18 }
 0x492   : > { %5609 = vmatmul.mubr.msk.f32.vlgmr.msra.gmra.mrb[4].mxu1 %vm8063_vm1, %v2456_v22  ;;  %v4516_v22 = vld [vmem:[#allocation7 + $0x10] sm:$0xf] }
 0x493   : > { %5612 = vmatpush3.msra.mxu1 %v2535_v28  ;;  %5613 = vmatprep.mubr.msk.f32.mxu1 %vm8174_vm10, %v6356_v18 }
 0x494   : > { %5616 = vmatprep.subr.mxu1 %v6356_v18 }
 0x499   : > { %v2141_v46 = vpop.permute.xlu0 %2140 }
 0x49a   : > { %5614 = vmatmul.mubr.msk.f32.vlgmr.msra.gmra.mrb[4].mxu1 %vm8063_vm1, %v2532_v29  ;;  %v4592_v29 = vld [vmem:[#allocation7 + $0x14] sm:$0xf] }
 0x49b   : > { %5617 = vmatpush3.msra.mxu1 %v2064_v35  ;;  %5618 = vmatprep.mubr.msk.f32.mxu1 %vm8174_vm10, %v6356_v18  ;;  %v3902_v35 = vrot.slane %v7831_v61, %v7034_v58 }
 0x49c   : > { %5621 = vmatprep.subr.mxu1 %v6356_v18 }
 0x4a2   : > { %5619 = vmatmul.mubr.msk.f32.vlgmr.msra.gmra.mrb[4].mxu1 %vm8063_vm1, %v2612_v37  ;;  %v4672_v37 = vld [vmem:[#allocation7 + $0x18] sm:$0xf] }
 0x4a3   : > { %5622 = vmatpush3.msra.mxu1 %v2691_v38  ;;  %5623 = vmatprep.mubr.msk.f32.mxu1 %vm8174_vm10, %v6356_v18 }
 0x4a4   : > { %5626 = vmatprep.subr.mxu1 %v6356_v18 }
 0x4aa   : > { %5624 = vmatmul.mubr.msk.f32.vlgmr.msra.gmra.mrb[4].mxu1 %vm8063_vm1, %v2688_v41  ;;  %v4748_v41 = vld [vmem:[#allocation7 + $0x1c] sm:$0xf] }
 0x4ab   : > { %5627 = vmatpush3.msra.mxu1 %v7673_v39  ;;  %5628 = vmatprep.mubr.msk.f32.mxu1 %vm8174_vm10, %v6356_v18 }
 0x4ac   : > { %5995 = vmatprep.subr.bf16.mxu1 %v6360_v30 }
 0x4b2   : > { %5629 = vmatmul.mubr.msk.f32.vlgmr.msra.gmra.mrb[4].mxu1 %vm8063_vm1, %v2768_v43  ;;  %vm3935_vm1 = vcmp.eq.s32.totalorder %v6646_v13, %v3894_v33 }
 0x4b3   : > { %5997 = vmatpush3.bf16.msk.msra.mxu1 %vm5996_vm15, %v6355_v12  ;;  %5647 = vmatprep.mubr.msk.f32.mxu1 %vm8174_vm10, %v6356_v18  ;;  %vm2900_vm15 = vcmp.eq.s32.totalorder %v6646_v13, %v2865_v42  ;;  %v4828_v42 = vld [vmem:[#allocation7 + $0x20] sm:$0xf] }
 0x4b4   : > { %5998 = vmatprep.subr.bf16.mxu1 %v6360_v30  ;;  %vm6005_vm4 = vmpackc.low %vm2905_vm6, %vm2900_vm15  ;;  %vm2883_vm15 = vcmp.eq.s32.totalorder %v6608_v7, %v2857_v45  ;;  %vm2889_vm6 = vcmp.eq.s32.totalorder %v6619_v10, %v2861_v44 }
 0x4b7   : > { %6000 = vmatpush3.bf16.msk.msra.mxu1 %vm5999_vm3, %v6355_v12  ;;  %vm2869_vm3 = vcmp.eq.s32.totalorder %v6588_v1, %v2861_v44 }
 0x4b8   : > { %6001 = vmatprep.subr.bf16.mxu1 %v6360_v30  ;;  %vm5979_vm14 = vmpackc.low %vm2874_vm0, %vm2869_vm3 }
 0x4b9   : > { %5980 = vmatprep.subr.msk.bf16.mxu0 %vm5979_vm14, %v6355_v12  ;;  %vm5985_vm3 = vmpackc.low %vm2883_vm15, %vm2878_vm9  ;;  %vm2888_vm14 = vcmp.eq.s32.totalorder %v6619_v10, %v2857_v45  ;;  %vm2903_vm9 = vcmp.eq.s32.totalorder %v6649_v14, %v2857_v45 }
 0x4bb   : > { %6003 = vmatpush3.bf16.msk.msra.mxu1 %vm6002_vm2, %v6355_v12  ;;  %vm2868_vm2 = vcmp.eq.s32.totalorder %v6588_v1, %v2857_v45 }
 0x4bc   : > { %6004 = vmatprep.subr.bf16.mxu1 %v6360_v30  ;;  %vm5981_vm11 = vmpackc.low %vm2873_vm12, %vm2868_vm2  ;;  %vm2893_vm2 = vcmp.eq.s32.totalorder %v6622_v11, %v2857_v45  ;;  %vm2899_vm12 = vcmp.eq.s32.totalorder %v6646_v13, %v2861_v44 }
 0x4bd   : > { %vm5989_vm7 = vmpackc.low %vm2893_vm2, %vm2888_vm14  ;;  %vm3903_vm14 = vcmp.eq.s32.totalorder %v6588_v1, %v7839_v63  ;;  %vm3908_vm2 = vcmp.eq.s32.totalorder %v6597_v4, %v7839_v63 }
 0x4bf   : > { %6006 = vmatpush3.bf16.msk.msra.mxu1 %vm6005_vm4, %v6355_v12  ;;  %vm2894_vm4 = vcmp.eq.s32.totalorder %v6622_v11, %v2861_v44 }
 0x4c0   : > { %5650 = vmatprep.subr.mxu1 %v6356_v18  ;;  %vm5987_vm0 = vmpackc.low %vm2894_vm4, %vm2889_vm6  ;;  %vm8175_vm6 = vcmask 1043456   ;;  %vm8176_vm4 = vcmask 31744  }
 0x585   : > { %v2838_v47 = vpop.f32.mrb[4].mxu1 }
 0x586   : > { %v6052_v48 = vadd.f32 %v2838_v47, %v2141_v46  ;;  %v5630_v49 = vpop.f32.mrb[5].mxu1 }
 0x588   : > { %v2843_v50 = vmax.f32 %v6052_v48, 0.0 }
 0x58a   : > { %v2844_v51 = vmin.f32 %v2843_v50, 4.0 }
 0x58c   : > { %5280 = vmatmul.mubr.msk.f32.vlgmr.msra.gmra.mrb[10].mxu0 %vm1921_vm13, %v2844_v51  ;;  %5648 = vmatmul.mubr.msk.f32.vlgmr.msra.gmra.mrb[6].mxu1 %vm1921_vm13, %v2844_v51 }
 0x58d   : > { %5982 = vmatpush1.bf16.msk.msra.mxu0 %vm5981_vm11, %v6355_v12  ;;  %3084 = vmatprep.mubr.f32.mxu0 %v6356_v18  ;;  %vm5991_vm11 = vmpackc.low %vm2904_vm8, %vm2899_vm12  ;;  %vm3914_vm8 = vcmp.eq.s32.totalorder %v6605_v6, %v7835_v62 }
 0x58e   : > { %5984 = vmatprep.subr.msk.bf16.mxu0 %vm5983_vm5, %v6355_v12  ;;  %5652 = vmatprep.mubr.msk.f32.mxu1 %vm8174_vm10, %v6356_v18  ;;  %vm2898_vm5 = vcmp.eq.s32.totalorder %v6646_v13, %v2857_v45 }
 0x58f   : > { %vm5993_vm15 = vmpackc.low %vm2903_vm9, %vm2898_vm5  ;;  %vm3913_vm5 = vcmp.eq.s32.totalorder %v6605_v6, %v7839_v63  ;;  %vm3918_vm9 = vcmp.eq.s32.totalorder %v6608_v7, %v7839_v63 }
 0x591   : > { %5986 = vmatpush1.bf16.msk.msra.mxu0 %vm5985_vm3, %v6355_v12  ;;  %vm3904_vm3 = vcmp.eq.s32.totalorder %v6588_v1, %v7835_v62 }
 0x592   : > { %5988 = vmatprep.subr.msk.bf16.mxu0 %vm5987_vm0, %v6355_v12  ;;  %vm3909_vm0 = vcmp.eq.s32.totalorder %v6597_v4, %v7835_v62 }
 0x593   : > { %vm6007_vm12 = vmpackc.low %vm3909_vm0, %vm3904_vm3 }
 0x594   : > { %vm6013_vm3 = vmpackc.low %vm3918_vm9, %vm3913_vm5 }
 0x595   : > { %5990 = vmatpush1.bf16.msk.msra.mxu0 %vm5989_vm7, %v6355_v12  ;;  %vm3919_vm7 = vcmp.eq.s32.totalorder %v6608_v7, %v7835_v62 }
 0x596   : > { %5992 = vmatprep.subr.msk.bf16.mxu0 %vm5991_vm11, %v6355_v12  ;;  %vm6009_vm11 = vmpackc.low %vm3908_vm2, %vm3903_vm14  ;;  %vm8177_vm14 = vcmask 1043456   ;;  %vm8178_vm2 = vcmask 31744  }
 0x597   : > { %vm8180_vm5 = vmmov %vm8178_vm2 }
 0x599   : > { %5994 = vmatpush1.bf16.msk.msra.mxu0 %vm5993_vm15, %v6355_v12  ;;  %vm6011_vm15 = vmpackc.low %vm3919_vm7, %vm3914_vm8  ;;  %vm3923_vm8 = vcmp.eq.s32.totalorder %v6619_v10, %v7839_v63  ;;  %vm3928_vm7 = vcmp.eq.s32.totalorder %v6622_v11, %v7839_v63 }
 0x59a   : > { %5655 = vmatprep.subr.mxu0 %v6356_v18 }
 0x59c   : > { %5297 = vmatmul.mubr.msk.f32.vlgmr.msra.gmra.mrb[12].mxu0 %vm1921_vm13, %v2844_v51 }
 0x59d   : > { %5657 = vmatprep.mubr.msk.f32.mxu0 %vm8174_vm10, %v6356_v18 }
 0x65f   : > { %v3015_v52 = vpop.f32.mrb[10].mxu0  ;;  %v7816_v53 = vpop.f32.mrb[6].mxu1 }
 0x660   : > { %3247 = vrot.lane.b32.xlu1 %v3015_v52, %s6358_s22  ;;  %v3017_v54 = vpop.f32.mrb[11].mxu0  ;;  %v5649_v55 = vpop.f32.mrb[7].mxu1  ;;  %5651 = vmatpush3.msk.msra.mxu1 %vm8175_vm6, %v3015_v52  ;;  %vm3924_vm6 = vcmp.eq.s32.totalorder %v6619_v10, %v7835_v62 }
 0x661   : > { %3406 = vrot.lane.b32.xlu0 %v3017_v54, %s6358_s22  ;;  %5653 = vmatmul.mubr.msk.f32.vlgmr.msra.gmra.mrb[8].mxu1 %vm8176_vm4, %v3167_v59  ;;  %vm3929_vm4 = vcmp.eq.s32.totalorder %v6622_v11, %v7835_v62 }
 0x662   : > { %4050 = vmatprep.mubr.f32.mxu1 %v6356_v18  ;;  %6008 = vmatprep.subr.msk.bf16.mxu1 %vm6007_vm12, %v6355_v12  ;;  %vm6015_vm0 = vmpackc.low %vm3929_vm4, %vm3924_vm6 }
 0x663   : > { %6010 = vmatpush1.bf16.msk.msra.mxu1 %vm6009_vm11, %v6355_v12  ;;  %vm8179_vm12 = vmmov %vm8177_vm14 }
 0x664   : > { %6012 = vmatprep.subr.msk.bf16.mxu1 %vm6011_vm15, %v6355_v12  ;;  %vm6017_vm11 = vmpackc.low %vm3928_vm7, %vm3923_vm8 }
 0x665   : > { %vm8181_vm9 = vmmov %vm8179_vm12 }
 0x666   : > { %vm8182_vm15 = vmmov %vm8178_vm2 }
 0x667   : > { %6014 = vmatpush1.bf16.msk.msra.mxu1 %vm6013_vm3, %v6355_v12  ;;  %vm8183_vm6 = vmmov %vm8181_vm9 }
 0x668   : > { %6016 = vmatprep.subr.msk.bf16.mxu1 %vm6015_vm0, %v6355_v12  ;;  %vm8184_vm4 = vmmov %vm8178_vm2 }
 0x669   : > { %vm8185_vm3 = vmmov %vm8183_vm6 }
 0x66a   : > { %vm8186_vm0 = vmmov %vm8178_vm2 }
 0x66b   : > { %6018 = vmatpush1.bf16.msk.msra.mxu1 %vm6017_vm11, %v6355_v12  ;;  %vm8190_vm8 = vmmov %vm8186_vm0  ;;  %vm3907_vm11 = vcmp.eq.s32.totalorder %v6588_v1, %v3902_v35 }
 0x66c   : > { %vm8191_vm7 = vmmov %vm8185_vm3 }
 0x66f   : > { %v3086_v56 = vpop.f32.mrb[12].mxu0 }
 0x670   : > { %3565 = vrot.lane.b32.xlu1 %v3086_v56, %s6358_s22  ;;  %v3088_v57 = vpop.f32.mrb[13].mxu0 }
 0x671   : > { %3724 = vrot.lane.b32.xlu0 %v3088_v57, %s6358_s22 }
 0x674   : > { %3164 = vperm.xlu1 %6186, %v3161_v60  }
 0x6d2   : > { %v3248_v3 = vpop.permute.xlu1 %3247 }
 0x6d3   : > { %5656 = vmatpush3.msk.msra.mxu0 %vm8177_vm14, %v3248_v3  ;;  %v3407_v5 = vpop.permute.xlu0 %3406  ;;  %vm8187_vm14 = vmmov %vm8185_vm3 }
 0x6d4   : > { %5658 = vmatmul.mubr.msk.f32.vlgmr.msra.gmra.mrb[14].mxu0 %vm8178_vm2, %v5309_v2  ;;  %5660 = vmatprep.subr.mxu0 %v6356_v18  ;;  %vm8188_vm2 = vmmov %vm8186_vm0 }
 0x6d5   : > { %5661 = vmatpush3.msk.msra.mxu0 %vm8179_vm12, %v3017_v54  ;;  %5662 = vmatprep.mubr.msk.f32.mxu0 %vm8174_vm10, %v6356_v18  ;;  %vm8189_vm12 = vmmov %vm8185_vm3 }
 0x6d6   : > { %5665 = vmatprep.subr.mxu0 %v6356_v18 }
 0x6dc   : > { %5663 = vmatmul.mubr.msk.f32.vlgmr.msra.gmra.mrb[14].mxu0 %vm8180_vm5, %v5312_v0  ;;  %vm3912_vm5 = vcmp.eq.s32.totalorder %v6597_v4, %v3902_v35 }
 0x6dd   : > { %5666 = vmatpush3.msk.msra.mxu0 %vm8181_vm9, %v3407_v5  ;;  %5667 = vmatprep.mubr.msk.f32.mxu0 %vm8174_vm10, %v6356_v18  ;;  %vm6040_vm9 = vmpackc.low %vm3912_vm5, %vm3907_vm11  ;;  %vm3933_vm11 = vcmp.eq.s32.totalorder %v6646_v13, %v7839_v63  ;;  %vm3938_vm5 = vcmp.eq.s32.totalorder %v6649_v14, %v7839_v63 }
 0x6de   : > { %5670 = vmatprep.subr.mxu0 %v6356_v18 }
 0x6e2   : > { %v3566_v27 = vpop.permute.xlu1 %3565 }
 0x6e3   : > { %v3725_v31 = vpop.permute.xlu0 %3724 }
 0x6e4   : > { %5668 = vmatmul.mubr.msk.f32.vlgmr.msra.gmra.mrb[14].mxu0 %vm8182_vm15, %v5315_v24  ;;  %vm3917_vm15 = vcmp.eq.s32.totalorder %v6605_v6, %v3902_v35 }
 0x6e5   : > { %5671 = vmatpush3.msk.msra.mxu0 %vm8183_vm6, %v3086_v56  ;;  %5672 = vmatprep.mubr.msk.f32.mxu0 %vm8174_vm10, %v6356_v18  ;;  %vm3922_vm6 = vcmp.eq.s32.totalorder %v6608_v7, %v3902_v35 }
 0x6e6   : > { %5675 = vmatprep.subr.mxu0 %v6356_v18 }
 0x6ec   : > { %5673 = vmatmul.mubr.msk.f32.vlgmr.msra.gmra.mrb[14].mxu0 %vm8184_vm4, %v5318_v25  ;;  %vm8192_vm4 = vmmov %vm8186_vm0 }
 0x6ed   : > { %5676 = vmatpush3.msk.msra.mxu0 %vm8185_vm3, %v3566_v27  ;;  %5677 = vmatprep.mubr.msk.f32.mxu0 %vm8174_vm10, %v6356_v18  ;;  %vm6043_vm3 = vmpackc.low %vm3922_vm6, %vm3917_vm15  ;;  %vm3937_vm15 = vcmp.eq.s32.totalorder %v6646_v13, %v3902_v35  ;;  %vm3942_vm6 = vcmp.eq.s32.totalorder %v6649_v14, %v3902_v35 }
 0x6ee   : > { %5680 = vmatprep.subr.mxu0 %v6356_v18 }
 0x6f3   : > { %v3165_v40 = vpop.permute.xlu1 %3164 }
 0x6f4   : > { %5678 = vmatmul.mubr.msk.f32.vlgmr.msra.gmra.mrb[14].mxu0 %vm8186_vm0, %v5321_v8  ;;  %vm3927_vm0 = vcmp.eq.s32.totalorder %v6619_v10, %v3902_v35 }
 0x6f5   : > { %5681 = vmatpush3.msk.msra.mxu0 %vm8187_vm14, %v3088_v57  ;;  %5682 = vmatprep.mubr.msk.f32.mxu0 %vm8174_vm10, %v6356_v18  ;;  %vm3932_vm14 = vcmp.eq.s32.totalorder %v6622_v11, %v3902_v35 }
 0x6f6   : > { %5685 = vmatprep.subr.mxu0 %v6356_v18 }
 0x6fc   : > { %5683 = vmatmul.mubr.msk.f32.vlgmr.msra.gmra.mrb[14].mxu0 %vm8188_vm2, %v5324_v9  ;;  %vm6046_vm2 = vmpackc.low %vm3932_vm14, %vm3927_vm0 }
 0x6fd   : > { %5686 = vmatpush3.msk.msra.mxu0 %vm8189_vm12, %v3725_v31  ;;  %5687 = vmatprep.mubr.msk.f32.mxu0 %vm8174_vm10, %v6356_v18  ;;  %vm3934_vm12 = vcmp.eq.s32.totalorder %v6646_v13, %v7835_v62 }
 0x6fe   : > { %5690 = vmatprep.subr.mxu0 %v6356_v18 }
 0x704   : > { %5688 = vmatmul.mubr.msk.f32.vlgmr.msra.gmra.mrb[14].mxu0 %vm8190_vm8, %v5327_v32  ;;  %vm3939_vm8 = vcmp.eq.s32.totalorder %v6649_v14, %v7835_v62 }
 0x705   : > { %5691 = vmatpush3.msk.msra.mxu0 %vm8191_vm7, %v7816_v53  ;;  %5692 = vmatprep.mubr.msk.f32.mxu0 %vm8174_vm10, %v6356_v18  ;;  %vm6019_vm7 = vmpackc.low %vm3939_vm8, %vm3934_vm12  ;;  %vm3910_vm12 = vcmp.eq.s32.totalorder %v6597_v4, %v3894_v33 }
 0x706   : > { %6039 = vmatprep.subr.bf16.mxu0 %v6360_v30  ;;  %6020 = vmatprep.subr.msk.bf16.mxu1 %vm6019_vm7, %v6355_v12 }
 0x70c   : > { %5693 = vmatmul.mubr.msk.f32.vlgmr.msra.gmra.mrb[14].mxu0 %vm8192_vm4, %v5330_v36  ;;  %vm6049_vm4 = vmpackc.low %vm3942_vm6, %vm3937_vm15  ;;  %vm3920_vm15 = vcmp.eq.s32.totalorder %v6608_v7, %v3894_v33 }
 0x70d   : > { %6041 = vmatpush3.bf16.msk.msra.mxu0 %vm6040_vm9, %v6355_v12  ;;  %5711 = vmatprep.mubr.msk.f32.mxu0 %vm8174_vm10, %v6356_v18  ;;  %vm6021_vm9 = vmpackc.low %vm3938_vm5, %vm3933_vm11 }
 0x70e   : > { %6042 = vmatprep.subr.bf16.mxu0 %v6360_v30  ;;  %6022 = vmatpush1.bf16.msk.msra.mxu1 %vm6021_vm9, %v6355_v12  ;;  %vm3915_vm9 = vcmp.eq.s32.totalorder %v6605_v6, %v3894_v33 }
 0x711   : > { %6044 = vmatpush3.bf16.msk.msra.mxu0 %vm6043_vm3, %v6355_v12 }
 0x712   : > { %6045 = vmatprep.subr.bf16.mxu0 %v6360_v30 }
 0x715   : > { %6047 = vmatpush3.bf16.msk.msra.mxu0 %vm6046_vm2, %v6355_v12  ;;  %vm3905_vm2 = vcmp.eq.s32.totalorder %v6588_v1, %v3894_v33 }
 0x716   : > { %6048 = vmatprep.subr.bf16.mxu0 %v6360_v30  ;;  %v3898_v30 = vrot.slane %v7831_v61, %v6664_v17  ;;  %vm6025_vm11 = vmpackc.low %vm3910_vm12, %vm3905_vm2  ;;  %vm3930_vm2 = vcmp.eq.s32.totalorder %v6622_v11, %v3894_v33 }
 0x718   : > { %vm3906_vm3 = vcmp.eq.s32.totalorder %v6588_v1, %v3898_v30  ;;  %vm3911_vm0 = vcmp.eq.s32.totalorder %v6597_v4, %v3898_v30  ;;  %vm3916_vm8 = vcmp.eq.s32.totalorder %v6605_v6, %v3898_v30  ;;  %vm3921_vm7 = vcmp.eq.s32.totalorder %v6608_v7, %v3898_v30  ;;  %v4204_v1 = vld [vmem:[#allocation7] sm:$0xf] }
 0x719   : > { %6050 = vmatpush3.bf16.msk.msra.mxu0 %vm6049_vm4, %v6355_v12  ;;  %vm6023_vm14 = vmpackc.low %vm3911_vm0, %vm3906_vm3  ;;  %vm3926_vm6 = vcmp.eq.s32.totalorder %v6619_v10, %v3898_v30  ;;  %vm3931_vm4 = vcmp.eq.s32.totalorder %v6622_v11, %v3898_v30  ;;  %vm3936_vm12 = vcmp.eq.s32.totalorder %v6646_v13, %v3898_v30  ;;  %v4198_v13 = vld [vmem:[#allocation9] sm:$0xf] }
 0x71a   : > { %6024 = vmatprep.subr.msk.bf16.mxu1 %vm6023_vm14, %v6355_v12  ;;  %vm6027_vm5 = vmpackc.low %vm3921_vm7, %vm3916_vm8  ;;  %vm3925_vm14 = vcmp.eq.s32.totalorder %v6619_v10, %v3894_v33  ;;  %vm3941_vm8 = vcmp.eq.s32.totalorder %v6649_v14, %v3898_v30 }
 0x71b   : > { %vm6029_vm3 = vmpackc.low %vm3920_vm15, %vm3915_vm9 }
 0x71c   : > { %vm6031_vm0 = vmpackc.low %vm3931_vm4, %vm3926_vm6 }
 0x71d   : > { %vm6033_vm7 = vmpackc.low %vm3930_vm2, %vm3925_vm14 }
 0x734   : > { %v3240_v58 = vpop.f32.mrb[8].mxu1 }
 0x735   : > { %v5654_v39 = vpop.f32.mrb[9].mxu1  ;;  %v3244_v23 = vadd.f32 %v3240_v58, %v3165_v40 }
 0x7df   : > { %v3876_v26 = vpop.f32.mrb[14].mxu0 }
 0x7e0   : > { %v6054_v17 = vadd.f32 %v3876_v26, %v3244_v23  ;;  %v5694_v34 = vpop.f32.mrb[15].mxu0 }
 0x7e2   : > { %v3881_v15 = vmax.f32 %v6054_v17, 0.0 }
 0x7e4   : > { %5349 = vmatmul.mubr.msk.f32.vlgmr.msra.gmra.mrb[10].mxu1 %vm1921_vm13, %v3881_v15  ;;  %5712 = vmatmul.mubr.msk.f32.vlgmr.msra.gmra.mrb[16].mxu0 %vm1921_vm13, %v3881_v15 }
 0x7e5   : > { %6026 = vmatpush1.bf16.msk.msra.mxu1 %vm6025_vm11, %v6355_v12  ;;  %4121 = vmatprep.mubr.f32.mxu1 %v6356_v18  ;;  %vm6035_vm11 = vmpackc.low %vm3941_vm8, %vm3936_vm12  ;;  %vm4903_vm12 = vcmask 519168  }
 0x7e6   : > { %6028 = vmatprep.subr.msk.bf16.mxu1 %vm6027_vm5, %v6355_v12  ;;  %vm3940_vm5 = vcmp.eq.s32.totalorder %v6649_v14, %v3894_v33  ;;  %v4280_v14 = vld [vmem:[#allocation7 + $0x4] sm:$0xf] }
 0x7e7   : > { %vm6037_vm9 = vmpackc.low %vm3940_vm5, %vm3935_vm1  ;;  %vm8193_vm1 = vcmask 64512  }
 0x7e8   : > { %vm8195_vm15 = vmmov %vm8193_vm1 }
 0x7e9   : > { %6030 = vmatpush1.bf16.msk.msra.mxu1 %vm6029_vm3, %v6355_v12  ;;  %vm8196_vm6 = vmmov %vm8193_vm1 }
 0x7ea   : > { %6032 = vmatprep.subr.msk.bf16.mxu1 %vm6031_vm0, %v6355_v12  ;;  %vm8197_vm4 = vmmov %vm8193_vm1 }
 0x7eb   : > { %vm8198_vm3 = vmmov %vm8193_vm1 }
 0x7ec   : > { %vm8199_vm0 = vmmov %vm8193_vm1 }
 0x7ed   : > { %6034 = vmatpush1.bf16.msk.msra.mxu1 %vm6033_vm7, %v6355_v12  ;;  %vm8200_vm14 = vmmov %vm8199_vm0 }
 0x7ee   : > { %6036 = vmatprep.subr.msk.bf16.mxu1 %vm6035_vm11, %v6355_v12  ;;  %vm8201_vm2 = vmmov %vm8199_vm0 }
 0x7f1   : > { %6038 = vmatpush1.bf16.msk.msra.mxu1 %vm6037_vm9, %v6355_v12 }
 0x7f2   : > { %5714 = vmatprep.subr.mxu1 %v6356_v18 }
 0x7f4   : > { %5366 = vmatmul.mubr.msk.f32.vlgmr.msra.gmra.mrb[12].mxu1 %vm1921_vm13, %v3881_v15  ;;  %vm8194_vm13 = vmmov %vm8193_vm1 }
 0x7f5   : > { %5716 = vmatprep.mubr.msk.f32.mxu1 %vm8174_vm10, %v6356_v18 }
 0x8b7   : > { %v4052_v4 = vpop.f32.mrb[10].mxu1  ;;  %v4194_v6 = vpop.f32.mrb[16].mxu0 }
 0x8b8   : > { %v5713_v7 = vpop.f32.mrb[17].mxu0  ;;  %4282 = vrot.lane.b32.xlu0 %v4052_v4, %s6358_s22  ;;  %v4054_v10 = vpop.f32.mrb[11].mxu1  ;;  %5715 = vmatpush3.msra.mxu1 %v4052_v4 }
 0x8b9   : > { %4438 = vrot.lane.b32.xlu1 %v4054_v10, %s6358_s22  ;;  %5717 = vmatmul.mubr.msk.f32.vlgmr.msra.gmra.mrb[14].mxu1 %vm8193_vm1, %v4204_v1 }
 0x8ba   : > { %5719 = vmatprep.subr.mxu1 %v6356_v18  ;;  %5721 = vmatprep.mubr.msk.f32.mxu1 %vm8174_vm10, %v6356_v18 }
 0x8c7   : > { %v4123_v11 = vpop.f32.mrb[12].mxu1 }
 0x8c8   : > { %4594 = vrot.lane.b32.xlu0 %v4123_v11, %s6358_s22  ;;  %v4125_v12 = vpop.f32.mrb[13].mxu1 }
 0x8c9   : > { %4750 = vrot.lane.b32.xlu1 %v4125_v12, %s6358_s22  ;;  %s5025_s22 = sshll.u32 %s8204_s28, 2 }
 0x8ca   : > { %s505_s20 = scalar_lea.vmem %s8055_s13, %s5025_s22 }
 0x8cc   : > { %4201 = vperm.xlu0 %6185, %v4198_v13  }
 0x92a   : > { %v4283_v20 = vpop.permute.xlu0 %4282 }
 0x92b   : > { %5720 = vmatpush3.msra.mxu1 %v4283_v20  ;;  %v4439_v19 = vpop.permute.xlu1 %4438 }
 0x92c   : > { %5722 = vmatmul.mubr.msk.f32.vlgmr.msra.gmra.mrb[14].mxu1 %vm8194_vm13, %v4280_v14  ;;  %5724 = vmatprep.subr.mxu1 %v6356_v18 }
 0x92d   : > { %5725 = vmatpush3.msra.mxu1 %v4054_v10  ;;  %5726 = vmatprep.mubr.msk.f32.mxu1 %vm8174_vm10, %v6356_v18 }
 0x92e   : > { %5729 = vmatprep.subr.mxu1 %v6356_v18 }
 0x934   : > { %5727 = vmatmul.mubr.msk.f32.vlgmr.msra.gmra.mrb[14].mxu1 %vm8195_vm15, %v4360_v16 }
 0x935   : > { %5730 = vmatpush3.msra.mxu1 %v4439_v19  ;;  %5731 = vmatprep.mubr.msk.f32.mxu1 %vm8174_vm10, %v6356_v18 }
 0x936   : > { %5734 = vmatprep.subr.mxu1 %v6356_v18 }
 0x93a   : > { %v4595_v28 = vpop.permute.xlu0 %4594 }
 0x93b   : > { %v4751_v38 = vpop.permute.xlu1 %4750 }
 0x93c   : > { %5732 = vmatmul.mubr.msk.f32.vlgmr.msra.gmra.mrb[14].mxu1 %vm8196_vm6, %v4436_v21 }
 0x93d   : > { %5735 = vmatpush3.msra.mxu1 %v4123_v11  ;;  %5736 = vmatprep.mubr.msk.f32.mxu1 %vm8174_vm10, %v6356_v18 }
 0x93e   : > { %5739 = vmatprep.subr.mxu1 %v6356_v18 }
 0x944   : > { %5737 = vmatmul.mubr.msk.f32.vlgmr.msra.gmra.mrb[14].mxu1 %vm8197_vm4, %v4516_v22 }
 0x945   : > { %5740 = vmatpush3.msra.mxu1 %v4595_v28  ;;  %5741 = vmatprep.mubr.msk.f32.mxu1 %vm8174_vm10, %v6356_v18 }
 0x946   : > { %5744 = vmatprep.subr.mxu1 %v6356_v18 }
 0x94b   : > { %v4202_v43 = vpop.permute.xlu0 %4201 }
 0x94c   : > { %5742 = vmatmul.mubr.msk.f32.vlgmr.msra.gmra.mrb[14].mxu1 %vm8198_vm3, %v4592_v29 }
 0x94d   : > { %5745 = vmatpush3.msra.mxu1 %v4125_v12  ;;  %5746 = vmatprep.mubr.msk.f32.mxu1 %vm8174_vm10, %v6356_v18 }
 0x94e   : > { %5749 = vmatprep.subr.mxu1 %v6356_v18 }
 0x954   : > { %5747 = vmatmul.mubr.msk.f32.vlgmr.msra.gmra.mrb[14].mxu1 %vm8199_vm0, %v4672_v37 }
 0x955   : > { %5750 = vmatpush3.msra.mxu1 %v4751_v38  ;;  %5751 = vmatprep.mubr.msk.f32.mxu1 %vm8174_vm10, %v6356_v18 }
 0x956   : > { %5754 = vmatprep.subr.mxu1 %v6356_v18 }
 0x95c   : > { %5752 = vmatmul.mubr.msk.f32.vlgmr.msra.gmra.mrb[14].mxu1 %vm8200_vm14, %v4748_v41 }
 0x95d   : > { %5755 = vmatpush3.msra.mxu1 %v4194_v6  ;;  %5756 = vmatprep.mubr.msk.f32.mxu1 %vm8174_vm10, %v6356_v18 }
 0x964   : > { %5757 = vmatmul.mubr.msk.f32.vlgmr.msra.gmra.mrb[14].mxu1 %vm8201_vm2, %v4828_v42 }
 0xa37   : > { %v4898_v44 = vpop.f32.mrb[14].mxu1 }
 0xa38   : > { %v6055_v45 = vadd.f32 %v4898_v44, %v4202_v43  ;;  %v5758_v46 = vpop.f32.mrb[15].mxu1 }
 0xa3a   : > { %4904 = vst.msk [vmem:[%s505_s20] sm:$0xf] %vm4903_vm12, %v6055_v45 }
 0xa3b PF: > { %s8202_s25 = sld [smem:[#allocation13_spill]] }
 0xa41   : > { %s26_s25 = sadd.s32 1, %s8202_s25  }
 0xa42   : > { %p23_p6 = scmp.ge.s32.totalorder %s26_s25, 4  }
 0xa44   :  { %25 = sbr.rel (!%p23_p6) target bundleno = 5 (0x5), region = 155 }
 0xa4b   :  { %4924 = vsyncpa [#allocation3], 1 }
 0xa4c   :  { %4926 = vsyncpa [#allocation3 + $0x1], 1 }
 0xa4d   :  { %4927 = vsyncpa [#allocation5], 1 }
 0xa4e   :  { %4928 = vsyncpa [#allocation8], 1 }

</bundles_post_ra>
